<compile_context>
chip_gen: v7x
topology: tpu7x:2x2x1
jax: 0.10.0
libtpu: 0.0.40
codegen_flags: <defaults>
</compile_context>

<pallas_src>
import jax
import jax.numpy as jnp
from jax.experimental import pallas as pl
from jax.experimental.pallas import tpu as pltpu

# ----------------------------------------------------------------------------
# Module hyperparameters (alpha scalar, beta[i] scalars) baked in as constants,
# mirroring the __init__ arguments of the PyTorch module.
# ----------------------------------------------------------------------------
ALPHA = 0.5
BETA = (0.75, 0.6, 0.4)

D_IN = 28 * 28                     # 784 (kept unpadded: full-dim block)
D_H1, D_H2, D_OUT = 350, 50, 10    # true layer widths
H1_PAD, H2_PAD, OUT_PAD = 384, 64, 128   # lane/sublane-friendly padded widths
NEG_INF_BIAS = -1e30               # pad bias so padded logits vanish in softmax


def _elementwise_dtype():
    """bf16 elementwise math on chips with a bf16 VALU (v6e/v7x),
    f32 on v5e-class / older chips (no bf16 VALU)."""
    try:
        kind = jax.devices()[0].device_kind.lower()
    except Exception:
        return jnp.bfloat16
    if any(t in kind for t in ("v2", "v3", "v4")):
        return jnp.float32
    if "v5" in kind and ("lite" in kind or "v5e" in kind):
        return jnp.float32
    return jnp.bfloat16


EW_DTYPE = _elementwise_dtype()


def _act_on(x, distr, beta_col):
    """Simplified NeuralMnist_v1.act_on.

    x        : (TB, D) activations (EW_DTYPE)
    distr    : (1, D)  "benign distribution", broadcast over batch
    beta_col : (1, D)  per-column threshold: beta at perturbed columns, -1 else

    Equivalent to the PyTorch chain:
        x_new = where(mask, distr, x); delta = x - x_new
        gate  = mask & (|delta| < beta); x[gate] -= alpha * delta[gate]
    (|.| >= 0, so beta_col = -1 on unperturbed columns disables the gate.)
    """
    gate = jnp.abs(x - distr) < beta_col
    if ALPHA == 0.5:
        blended = (x + distr) * 0.5
    else:
        blended = x + ALPHA * (distr - x)
    return jnp.where(gate, blended, x)


def _mnist_kernel(x_ref,
                  w1_ref, b1_ref, w2_ref, b2_ref, w3_ref, b3_ref,
                  bc0_ref, d0_ref, bc1_ref, d1_ref, bc2_ref, d2_ref,
                  out_ref):
    ew = EW_DTYPE

    # --- act_on on the flattened input (single in-kernel cast of the f32 stream)
    x = x_ref[...].astype(ew)                                    # (TB, 784)
    x = _act_on(x, d0_ref[...].astype(ew), bc0_ref[...].astype(ew))

    # --- fc1 + relu + act_on ----------------------------------------------------
    h1 = jnp.dot(x.astype(jnp.bfloat16), w1_ref[...],
                 preferred_element_type=jnp.float32)             # (TB, 384) f32
    h1 = jnp.maximum((h1 + b1_ref[...]).astype(ew), 0.0)
    h1 = _act_on(h1, d1_ref[...].astype(ew), bc1_ref[...].astype(ew))

    # --- fc2 + relu + act_on ----------------------------------------------------
    h2 = jnp.dot(h1.astype(jnp.bfloat16), w2_ref[...],
                 preferred_element_type=jnp.float32)             # (TB, 64) f32
    h2 = jnp.maximum((h2 + b2_ref[...]).astype(ew), 0.0)
    h2 = _act_on(h2, d2_ref[...].astype(ew), bc2_ref[...].astype(ew))

    # --- fc3 (padded to 128 lanes) + log_softmax (f32) ---------------------------
    logits = jnp.dot(h2.astype(jnp.bfloat16), w3_ref[...],
                     preferred_element_type=jnp.float32)         # (TB, 128)
    logits = logits + b3_ref[...]        # pad columns get -1e30 -> exp == 0

    m = jnp.max(logits, axis=1, keepdims=True)
    shifted = logits - m
    lse = jnp.log(jnp.sum(jnp.exp(shifted), axis=1, keepdims=True))
    out_ref[...] = shifted - lse         # lane-dense (TB, 128) f32 store


def _round_up(n, m):
    return ((n + m - 1) // m) * m


@jax.jit
def neural_mnist_forward(x_nchw, packed):
    """x_nchw: (B, 1, 28, 28) f32, NCHW like the PyTorch module.

    packed: dict of pre-padded / pre-transposed operands from pack_params().
    Returns (B, 10) f32 log-probabilities.
    """
    B = x_nchw.shape[0]
    x = x_nchw.reshape(B, -1)                          # (B, 784) f32 — no extra pass

    # Batch tile: multiple of 16 (bf16 sublane packing), capped at 1024 so the
    # f32 input blocks + f32 temporaries fit the 32 MiB VMEM limit set below
    # on every generation (v5e 16 MiB default scoped, v7x 64 MiB physical).
    TB = min(1024, _round_up(B, 16))
    B_pad = _round_up(B, TB)
    if B_pad != B:
        x = jnp.pad(x, ((0, B_pad - B), (0, 0)))
    grid = (B_pad // TB,)

    operands = (
        x,
        packed["w1t"], packed["b1"],
        packed["w2t"], packed["b2"],
        packed["w3t"], packed["b3"],
        packed["beta_col0"], packed["distr0"],
        packed["beta_col1"], packed["distr1"],
        packed["beta_col2"], packed["distr2"],
    )

    def resident(arr):
        # Full-array 2-D block with a constant index_map -> DMA'd once,
        # resident in VMEM across the whole grid.
        return pl.BlockSpec(arr.shape, lambda i: (0, 0))

    in_specs = [pl.BlockSpec((TB, D_IN), lambda i: (i, 0))] + [
        resident(a) for a in operands[1:]
    ]
    out_spec = pl.BlockSpec((TB, OUT_PAD), lambda i: (i, 0))

    flops = 2 * B_pad * (D_IN * H1_PAD + H1_PAD * H2_PAD + H2_PAD * OUT_PAD)
    bytes_accessed = (
        x.size * x.dtype.itemsize
        + sum(a.size * a.dtype.itemsize for a in operands[1:])
        + B_pad * OUT_PAD * 4
    )
    cost = pl.CostEstimate(flops=flops,
                           transcendentals=B_pad * OUT_PAD,
                           bytes_accessed=bytes_accessed)

    # NOTE(v7x): "parallel" alone does not split the grid across the two
    # TensorCores; switching the batch axis to pltpu.CORE_PARALLEL (or using
    # pl.core_map over a 2-TC mesh) is the intended follow-up once validated
    # on a v7x host.  Kept as "parallel" here so the kernel runs cleanly on
    # single-TC chips.
    out_padded = pl.pallas_call(
        _mnist_kernel,
        out_shape=jax.ShapeDtypeStruct((B_pad, OUT_PAD), jnp.float32),
        grid=grid,
        in_specs=in_specs,
        out_specs=out_spec,
        compiler_params=pltpu.CompilerParams(
            dimension_semantics=("parallel",),
            vmem_limit_bytes=32 * 1024 * 1024),
        cost_estimate=cost,
    )(*operands)

    return out_padded[:B, :D_OUT]


# ----------------------------------------------------------------------------
# Convert nn.Linear-style parameters + act_on config into the padded, bf16,
# pre-transposed operands the kernel expects.
# ----------------------------------------------------------------------------
def pack_params(w1, b1, w2, b2, w3, b3, indices, distrs):
    """w*: (out_features, in_features) f32;  b*: (out_features,) f32;
    indices: 3 int32 index arrays (per layer);  distrs: 3 arrays (D_layer,)."""

    def pad2(a, rows, cols):
        return jnp.pad(a, ((0, rows - a.shape[0]), (0, cols - a.shape[1])))

    def pad1(a, n, value=0.0):
        return jnp.pad(a, (0, n - a.shape[0]), constant_values=value)

    def beta_col(idx, beta, d, d_pad):
        # beta at perturbed columns, -1 elsewhere (|.| >= 0 => gate disabled);
        # empty idx => all -1, matching the PyTorch `if len(...) > 0` skip.
        bc = jnp.full((d,), -1.0, jnp.float32)
        if idx.shape[0] > 0:
            bc = bc.at[idx].set(beta)
        return pad1(bc, d_pad, value=-1.0).reshape(1, d_pad)

    return {
        # pre-transposed (in, out), zero-padded, bf16
        "w1t": pad2(w1.T, D_IN, H1_PAD).astype(jnp.bfloat16),
        "w2t": pad2(w2.T, H1_PAD, H2_PAD).astype(jnp.bfloat16),
        "w3t": pad2(w3.T, H2_PAD, OUT_PAD).astype(jnp.bfloat16),
        # biases stay f32; fc3 pad bias is very negative so softmax ignores it
        "b1": pad1(b1, H1_PAD).reshape(1, H1_PAD).astype(jnp.float32),
        "b2": pad1(b2, H2_PAD).reshape(1, H2_PAD).astype(jnp.float32),
        "b3": pad1(b3, OUT_PAD, NEG_INF_BIAS).reshape(1, OUT_PAD).astype(jnp.float32),
        # per-layer column thresholds + benign distributions (f32, zero-padded)
        "beta_col0": beta_col(indices[0], BETA[0], D_IN, D_IN),
        "beta_col1": beta_col(indices[1], BETA[1], D_H1, H1_PAD),
        "beta_col2": beta_col(indices[2], BETA[2], D_H2, H2_PAD),
        "distr0": pad1(distrs[0], D_IN).reshape(1, D_IN).astype(jnp.float32),
        "distr1": pad1(distrs[1], H1_PAD).reshape(1, H1_PAD).astype(jnp.float32),
        "distr2": pad1(distrs[2], H2_PAD).reshape(1, H2_PAD).astype(jnp.float32),
    }


# ----------------------------------------------------------------------------
# Pure-JAX reference mirroring the PyTorch forward with the kernel's dtype
# policy (elementwise in EW_DTYPE, bf16 MXU inputs, f32 accumulation) so the
# tolerance check stays tight.  NOTE: on bf16-VALU chips the gated comparison
# |x - distr| < beta is evaluated in bf16 — values within bf16 rounding of the
# threshold may gate differently than a true f32 PyTorch run.
# ----------------------------------------------------------------------------
def _reference_forward(x_nchw, w1, b1, w2, b2, w3, b3, indices, distrs):
    ew = EW_DTYPE

    def act_on(x, idx, distr, beta):
        if idx.shape[0] == 0:                     # matches the `if len(...) > 0`
            return x
        bc = jnp.full((x.shape[1],), -1.0, jnp.float32).at[idx].set(beta)
        return _act_on(x, distr[None, :].astype(ew), bc[None, :].astype(ew))

    def mxu_dot(a, w):  # nn.Linear: a @ w.T with bf16 MXU inputs, f32 accumulation
        return jnp.dot(a.astype(jnp.bfloat16), w.T.astype(jnp.bfloat16),
                       preferred_element_type=jnp.float32)

    B = x_nchw.shape[0]
    x = x_nchw.reshape(B, -1).astype(ew)
    x = act_on(x, indices[0], distrs[0], BETA[0])
    h1 = jnp.maximum((mxu_dot(x, w1) + b1).astype(ew), 0.0)
    h1 = act_on(h1, indices[1], distrs[1], BETA[1])
    h2 = jnp.maximum((mxu_dot(h1, w2) + b2).astype(ew), 0.0)
    h2 = act_on(h2, indices[2], distrs[2], BETA[2])
    logits = mxu_dot(h2, w3) + b3
    return jax.nn.log_softmax(logits.astype(jnp.float32), axis=1)


if __name__ == "__main__":
    key = jax.random.PRNGKey(0)
    ks = jax.random.split(key, 10)

    B = 8
    x = jax.random.normal(ks[0], (B, 1, 28, 28), jnp.float32)    # NCHW input

    def linear(kw, kb, fan_in, fan_out):
        bound = 1.0 / (fan_in ** 0.5)
        w = jax.random.uniform(kw, (fan_out, fan_in), jnp.float32, -bound, bound)
        b = jax.random.uniform(kb, (fan_out,), jnp.float32, -bound, bound)
        return w, b

    w1, b1 = linear(ks[1], ks[2], D_IN, D_H1)
    w2, b2 = linear(ks[3], ks[4], D_H1, D_H2)
    w3, b3 = linear(ks[5], ks[6], D_H2, D_OUT)

    # specific_indices and benign distributions per layer (deterministic)
    indices = (jnp.array([3, 17, 100, 512], jnp.int32),
               jnp.array([5, 42, 199], jnp.int32),
               jnp.array([1, 7, 33], jnp.int32))
    distrs = (jax.random.normal(ks[7], (D_IN,), jnp.float32),
              jax.random.normal(ks[8], (D_H1,), jnp.float32),
              jax.random.normal(ks[9], (D_H2,), jnp.float32))

    packed = pack_params(w1, b1, w2, b2, w3, b3, indices, distrs)

    out = neural_mnist_forward(x, packed)
    out = jax.block_until_ready(out)

    ref = _reference_forward(x, w1, b1, w2, b2, w3, b3, indices, distrs)
    assert out.shape == (B, D_OUT)
    max_err = float(jnp.max(jnp.abs(out - ref)))
    assert jnp.allclose(out, ref, atol=5e-3, rtol=5e-3), \
        f"mismatch vs reference (max |err|={max_err})"

    print("KERNEL_OK")
</pallas_src>

<mosaic_0001>
module attributes {stable_mosaic.version = 11 : i64} {
  func.func @_mnist_kernel(%arg0: i32, %arg1: memref<16x784xf32, #tpu.memory_space<vmem>>, %arg2: memref<784x384xbf16, #tpu.memory_space<vmem>>, %arg3: memref<1x384xf32, #tpu.memory_space<vmem>>, %arg4: memref<384x64xbf16, #tpu.memory_space<vmem>>, %arg5: memref<1x64xf32, #tpu.memory_space<vmem>>, %arg6: memref<64x128xbf16, #tpu.memory_space<vmem>>, %arg7: memref<1x128xf32, #tpu.memory_space<vmem>>, %arg8: memref<1x784xf32, #tpu.memory_space<vmem>>, %arg9: memref<1x784xf32, #tpu.memory_space<vmem>>, %arg10: memref<1x384xf32, #tpu.memory_space<vmem>>, %arg11: memref<1x384xf32, #tpu.memory_space<vmem>>, %arg12: memref<1x64xf32, #tpu.memory_space<vmem>>, %arg13: memref<1x64xf32, #tpu.memory_space<vmem>>, %arg14: memref<16x128xf32, #tpu.memory_space<vmem>>) attributes {dimension_semantics = [#tpu.dimension_semantics<parallel>], iteration_bounds = array<i64: 1>, scalar_prefetch = 0 : i64, scratch_operands = 0 : i64, tpu.core_type = #tpu.core_type<tc>, window_params = [{transform_indices = @transform_0, window_bounds = array<i64: 16, 784>}, {pipeline_mode = #tpu.pipeline_mode<synchronous>, transform_indices = @transform_1, window_bounds = array<i64: 784, 384>}, {pipeline_mode = #tpu.pipeline_mode<synchronous>, transform_indices = @transform_2, window_bounds = array<i64: 1, 384>}, {pipeline_mode = #tpu.pipeline_mode<synchronous>, transform_indices = @transform_3, window_bounds = array<i64: 384, 64>}, {pipeline_mode = #tpu.pipeline_mode<synchronous>, transform_indices = @transform_4, window_bounds = array<i64: 1, 64>}, {pipeline_mode = #tpu.pipeline_mode<synchronous>, transform_indices = @transform_5, window_bounds = array<i64: 64, 128>}, {pipeline_mode = #tpu.pipeline_mode<synchronous>, transform_indices = @transform_6, window_bounds = array<i64: 1, 128>}, {pipeline_mode = #tpu.pipeline_mode<synchronous>, transform_indices = @transform_7, window_bounds = array<i64: 1, 784>}, {pipeline_mode = #tpu.pipeline_mode<synchronous>, transform_indices = @transform_8, window_bounds = array<i64: 1, 784>}, {pipeline_mode = #tpu.pipeline_mode<synchronous>, transform_indices = @transform_9, window_bounds = array<i64: 1, 384>}, {pipeline_mode = #tpu.pipeline_mode<synchronous>, transform_indices = @transform_10, window_bounds = array<i64: 1, 384>}, {pipeline_mode = #tpu.pipeline_mode<synchronous>, transform_indices = @transform_11, window_bounds = array<i64: 1, 64>}, {pipeline_mode = #tpu.pipeline_mode<synchronous>, transform_indices = @transform_12, window_bounds = array<i64: 1, 64>}, {transform_indices = @transform_13, window_bounds = array<i64: 16, 128>}]} {
    %c0 = arith.constant 0 : index
    %c0_0 = arith.constant 0 : index
    %0 = vector.load %arg1[%c0, %c0_0] : memref<16x784xf32, #tpu.memory_space<vmem>>, vector<16x784xf32>
    %1 = arith.truncf %0 : vector<16x784xf32> to vector<16x784xbf16>
    %c0_1 = arith.constant 0 : index
    %c0_2 = arith.constant 0 : index
    %2 = vector.load %arg9[%c0_1, %c0_2] : memref<1x784xf32, #tpu.memory_space<vmem>>, vector<1x784xf32>
    %3 = arith.truncf %2 : vector<1x784xf32> to vector<1x784xbf16>
    %c0_3 = arith.constant 0 : index
    %c0_4 = arith.constant 0 : index
    %4 = vector.load %arg8[%c0_3, %c0_4] : memref<1x784xf32, #tpu.memory_space<vmem>>, vector<1x784xf32>
    %5 = arith.truncf %4 : vector<1x784xf32> to vector<1x784xbf16>
    %6 = vector.broadcast %3 : vector<1x784xbf16> to vector<16x784xbf16>
    %7 = arith.subf %1, %6 : vector<16x784xbf16>
    %8 = math.absf %7 : vector<16x784xbf16>
    %9 = vector.broadcast %5 : vector<1x784xbf16> to vector<16x784xbf16>
    %10 = arith.cmpf olt, %8, %9 : vector<16x784xbf16>
    %11 = vector.broadcast %3 : vector<1x784xbf16> to vector<16x784xbf16>
    %12 = arith.addf %1, %11 : vector<16x784xbf16>
    %cst = arith.constant 5.000000e-01 : bf16
    %13 = vector.broadcast %cst : bf16 to vector<16x784xbf16>
    %14 = arith.mulf %12, %13 : vector<16x784xbf16>
    %15 = arith.select %10, %14, %1 : vector<16x784xi1>, vector<16x784xbf16>
    %c0_5 = arith.constant 0 : index
    %c0_6 = arith.constant 0 : index
    %16 = vector.load %arg2[%c0_5, %c0_6] : memref<784x384xbf16, #tpu.memory_space<vmem>>, vector<784x384xbf16>
    %cst_7 = arith.constant dense<0.000000e+00> : vector<16x384xf32>
    %17 = tpu.matmul %15, %16, %cst_7 {dimension_numbers = #tpu.dot_dimension_numbers<[1], [0], [0], [1], [0, 0, 1, 1], [], []>} : vector<16x784xbf16>, vector<784x384xbf16>, vector<16x384xf32> -> vector<16x384xf32>
    %c0_8 = arith.constant 0 : index
    %c0_9 = arith.constant 0 : index
    %18 = vector.load %arg3[%c0_8, %c0_9] : memref<1x384xf32, #tpu.memory_space<vmem>>, vector<1x384xf32>
    %19 = vector.broadcast %18 : vector<1x384xf32> to vector<16x384xf32>
    %20 = arith.addf %17, %19 : vector<16x384xf32>
    %21 = arith.truncf %20 : vector<16x384xf32> to vector<16x384xbf16>
    %cst_10 = arith.constant 0.000000e+00 : bf16
    %22 = vector.broadcast %cst_10 : bf16 to vector<16x384xbf16>
    %23 = arith.maximumf %21, %22 : vector<16x384xbf16>
    %c0_11 = arith.constant 0 : index
    %c0_12 = arith.constant 0 : index
    %24 = vector.load %arg11[%c0_11, %c0_12] : memref<1x384xf32, #tpu.memory_space<vmem>>, vector<1x384xf32>
    %25 = arith.truncf %24 : vector<1x384xf32> to vector<1x384xbf16>
    %c0_13 = arith.constant 0 : index
    %c0_14 = arith.constant 0 : index
    %26 = vector.load %arg10[%c0_13, %c0_14] : memref<1x384xf32, #tpu.memory_space<vmem>>, vector<1x384xf32>
    %27 = arith.truncf %26 : vector<1x384xf32> to vector<1x384xbf16>
    %28 = vector.broadcast %25 : vector<1x384xbf16> to vector<16x384xbf16>
    %29 = arith.subf %23, %28 : vector<16x384xbf16>
    %30 = math.absf %29 : vector<16x384xbf16>
    %31 = vector.broadcast %27 : vector<1x384xbf16> to vector<16x384xbf16>
    %32 = arith.cmpf olt, %30, %31 : vector<16x384xbf16>
    %33 = vector.broadcast %25 : vector<1x384xbf16> to vector<16x384xbf16>
    %34 = arith.addf %23, %33 : vector<16x384xbf16>
    %cst_15 = arith.constant 5.000000e-01 : bf16
    %35 = vector.broadcast %cst_15 : bf16 to vector<16x384xbf16>
    %36 = arith.mulf %34, %35 : vector<16x384xbf16>
    %37 = arith.select %32, %36, %23 : vector<16x384xi1>, vector<16x384xbf16>
    %c0_16 = arith.constant 0 : index
    %c0_17 = arith.constant 0 : index
    %38 = vector.load %arg4[%c0_16, %c0_17] : memref<384x64xbf16, #tpu.memory_space<vmem>>, vector<384x64xbf16>
    %cst_18 = arith.constant dense<0.000000e+00> : vector<16x64xf32>
    %39 = tpu.matmul %37, %38, %cst_18 {dimension_numbers = #tpu.dot_dimension_numbers<[1], [0], [0], [1], [0, 0, 1, 1], [], []>} : vector<16x384xbf16>, vector<384x64xbf16>, vector<16x64xf32> -> vector<16x64xf32>
    %c0_19 = arith.constant 0 : index
    %c0_20 = arith.constant 0 : index
    %40 = vector.load %arg5[%c0_19, %c0_20] : memref<1x64xf32, #tpu.memory_space<vmem>>, vector<1x64xf32>
    %41 = vector.broadcast %40 : vector<1x64xf32> to vector<16x64xf32>
    %42 = arith.addf %39, %41 : vector<16x64xf32>
    %43 = arith.truncf %42 : vector<16x64xf32> to vector<16x64xbf16>
    %cst_21 = arith.constant 0.000000e+00 : bf16
    %44 = vector.broadcast %cst_21 : bf16 to vector<16x64xbf16>
    %45 = arith.maximumf %43, %44 : vector<16x64xbf16>
    %c0_22 = arith.constant 0 : index
    %c0_23 = arith.constant 0 : index
    %46 = vector.load %arg13[%c0_22, %c0_23] : memref<1x64xf32, #tpu.memory_space<vmem>>, vector<1x64xf32>
    %47 = arith.truncf %46 : vector<1x64xf32> to vector<1x64xbf16>
    %c0_24 = arith.constant 0 : index
    %c0_25 = arith.constant 0 : index
    %48 = vector.load %arg12[%c0_24, %c0_25] : memref<1x64xf32, #tpu.memory_space<vmem>>, vector<1x64xf32>
    %49 = arith.truncf %48 : vector<1x64xf32> to vector<1x64xbf16>
    %50 = vector.broadcast %47 : vector<1x64xbf16> to vector<16x64xbf16>
    %51 = arith.subf %45, %50 : vector<16x64xbf16>
    %52 = math.absf %51 : vector<16x64xbf16>
    %53 = vector.broadcast %49 : vector<1x64xbf16> to vector<16x64xbf16>
    %54 = arith.cmpf olt, %52, %53 : vector<16x64xbf16>
    %55 = vector.broadcast %47 : vector<1x64xbf16> to vector<16x64xbf16>
    %56 = arith.addf %45, %55 : vector<16x64xbf16>
    %cst_26 = arith.constant 5.000000e-01 : bf16
    %57 = vector.broadcast %cst_26 : bf16 to vector<16x64xbf16>
    %58 = arith.mulf %56, %57 : vector<16x64xbf16>
    %59 = arith.select %54, %58, %45 : vector<16x64xi1>, vector<16x64xbf16>
    %c0_27 = arith.constant 0 : index
    %c0_28 = arith.constant 0 : index
    %60 = vector.load %arg6[%c0_27, %c0_28] : memref<64x128xbf16, #tpu.memory_space<vmem>>, vector<64x128xbf16>
    %cst_29 = arith.constant dense<0.000000e+00> : vector<16x128xf32>
    %61 = tpu.matmul %59, %60, %cst_29 {dimension_numbers = #tpu.dot_dimension_numbers<[1], [0], [0], [1], [0, 0, 1, 1], [], []>} : vector<16x64xbf16>, vector<64x128xbf16>, vector<16x128xf32> -> vector<16x128xf32>
    %c0_30 = arith.constant 0 : index
    %c0_31 = arith.constant 0 : index
    %62 = vector.load %arg7[%c0_30, %c0_31] : memref<1x128xf32, #tpu.memory_space<vmem>>, vector<1x128xf32>
    %63 = vector.broadcast %62 : vector<1x128xf32> to vector<16x128xf32>
    %64 = arith.addf %61, %63 : vector<16x128xf32>
    %cst_32 = arith.constant dense<0xFF800000> : vector<16xf32>
    %65 = vector.multi_reduction <maximumf>, %64, %cst_32 [1] : vector<16x128xf32> to vector<16xf32>
    %66 = vector.shape_cast %65 : vector<16xf32> to vector<16x1xf32>
    %67 = vector.broadcast %66 : vector<16x1xf32> to vector<16x128xf32>
    %68 = arith.subf %64, %67 : vector<16x128xf32>
    %69 = math.exp %68 : vector<16x128xf32>
    %cst_33 = arith.constant dense<0.000000e+00> : vector<16xf32>
    %70 = vector.multi_reduction <add>, %69, %cst_33 [1] : vector<16x128xf32> to vector<16xf32>
    %71 = vector.shape_cast %70 : vector<16xf32> to vector<16x1xf32>
    %72 = math.log %71 : vector<16x1xf32>
    %73 = vector.broadcast %72 : vector<16x1xf32> to vector<16x128xf32>
    %74 = arith.subf %68, %73 : vector<16x128xf32>
    %c0_34 = arith.constant 0 : index
    %c0_35 = arith.constant 0 : index
    %75 = vector.load %arg14[%c0_34, %c0_35] : memref<16x128xf32, #tpu.memory_space<vmem>>, vector<16x128xf32>
    tpu.vector_store %arg14[%c0_34, %c0_35], %74 {strides = array<i32>} : memref<16x128xf32, #tpu.memory_space<vmem>>, vector<16x128xf32>,
    return
  }
  func.func @transform_0(%arg0: i32) -> (i32, i32) {
    %c0_i32 = arith.constant 0 : i32
    %c0_i32_0 = arith.constant 0 : i32
    return %arg0, %c0_i32 : i32, i32
  }
  func.func @transform_1(%arg0: i32) -> (i32, i32) {
    %c0_i32 = arith.constant 0 : i32
    %c0_i32_0 = arith.constant 0 : i32
    %c0_i32_1 = arith.constant 0 : i32
    return %c0_i32, %c0_i32_0 : i32, i32
  }
  func.func @transform_2(%arg0: i32) -> (i32, i32) {
    %c0_i32 = arith.constant 0 : i32
    %c0_i32_0 = arith.constant 0 : i32
    %c0_i32_1 = arith.constant 0 : i32
    return %c0_i32, %c0_i32_0 : i32, i32
  }
  func.func @transform_3(%arg0: i32) -> (i32, i32) {
    %c0_i32 = arith.constant 0 : i32
    %c0_i32_0 = arith.constant 0 : i32
    %c0_i32_1 = arith.constant 0 : i32
    return %c0_i32, %c0_i32_0 : i32, i32
  }
  func.func @transform_4(%arg0: i32) -> (i32, i32) {
    %c0_i32 = arith.constant 0 : i32
    %c0_i32_0 = arith.constant 0 : i32
    %c0_i32_1 = arith.constant 0 : i32
    return %c0_i32, %c0_i32_0 : i32, i32
  }
  func.func @transform_5(%arg0: i32) -> (i32, i32) {
    %c0_i32 = arith.constant 0 : i32
    %c0_i32_0 = arith.constant 0 : i32
    %c0_i32_1 = arith.constant 0 : i32
    return %c0_i32, %c0_i32_0 : i32, i32
  }
  func.func @transform_6(%arg0: i32) -> (i32, i32) {
    %c0_i32 = arith.constant 0 : i32
    %c0_i32_0 = arith.constant 0 : i32
    %c0_i32_1 = arith.constant 0 : i32
    return %c0_i32, %c0_i32_0 : i32, i32
  }
  func.func @transform_7(%arg0: i32) -> (i32, i32) {
    %c0_i32 = arith.constant 0 : i32
    %c0_i32_0 = arith.constant 0 : i32
    %c0_i32_1 = arith.constant 0 : i32
    return %c0_i32, %c0_i32_0 : i32, i32
  }
  func.func @transform_8(%arg0: i32) -> (i32, i32) {
    %c0_i32 = arith.constant 0 : i32
    %c0_i32_0 = arith.constant 0 : i32
    %c0_i32_1 = arith.constant 0 : i32
    return %c0_i32, %c0_i32_0 : i32, i32
  }
  func.func @transform_9(%arg0: i32) -> (i32, i32) {
    %c0_i32 = arith.constant 0 : i32
    %c0_i32_0 = arith.constant 0 : i32
    %c0_i32_1 = arith.constant 0 : i32
    return %c0_i32, %c0_i32_0 : i32, i32
  }
  func.func @transform_10(%arg0: i32) -> (i32, i32) {
    %c0_i32 = arith.constant 0 : i32
    %c0_i32_0 = arith.constant 0 : i32
    %c0_i32_1 = arith.constant 0 : i32
    return %c0_i32, %c0_i32_0 : i32, i32
  }
  func.func @transform_11(%arg0: i32) -> (i32, i32) {
    %c0_i32 = arith.constant 0 : i32
    %c0_i32_0 = arith.constant 0 : i32
    %c0_i32_1 = arith.constant 0 : i32
    return %c0_i32, %c0_i32_0 : i32, i32
  }
  func.func @transform_12(%arg0: i32) -> (i32, i32) {
    %c0_i32 = arith.constant 0 : i32
    %c0_i32_0 = arith.constant 0 : i32
    %c0_i32_1 = arith.constant 0 : i32
    return %c0_i32, %c0_i32_0 : i32, i32
  }
  func.func @transform_13(%arg0: i32) -> (i32, i32) {
    %c0_i32 = arith.constant 0 : i32
    %c0_i32_0 = arith.constant 0 : i32
    return %arg0, %c0_i32 : i32, i32
  }
}

</mosaic_0001>

<bundles_post_ra>
// kernel: neural_mnist_forward.1
= control target key start
LH: loop header
LB: loop body
LE: loop exit
PB: predicated region body
PF: predicated region fallthrough
CT: control target
= control target key end

     0   :  { %18 = vsyncpa [#allocation3], 0  ;;  %s3874_s0 = inlined_call_operand.vmem [shape: f32[16,784], index: 0, kind: input, shape index: {}]   ;;  %s3875_s1 = inlined_call_operand.vmem [shape: bf16[784,384], index: 1, kind: input, shape index: {}]   ;;  %s3876_s2 = inlined_call_operand.vmem [shape: f32[1,384], index: 2, kind: input, shape index: {}]   ;;  %s3877_s3 = inlined_call_operand.vmem [shape: bf16[384,64], index: 3, kind: input, shape index: {}]   ;;  %s3878_s4 = inlined_call_operand.vmem [shape: f32[1,64], index: 4, kind: input, shape index: {}]   ;;  %s3879_s5 = inlined_call_operand.hbm [shape: bf16[64,128], index: 5, kind: input, shape index: {}]   ;;  %s3880_s6 = inlined_call_operand.vmem [shape: f32[1,128], index: 6, kind: input, shape index: {}]   ;;  %s3881_s7 = inlined_call_operand.hbm [shape: f32[1,784], index: 7, kind: input, shape index: {}]   ;;  %s3882_s8 = inlined_call_operand.hbm [shape: f32[1,784], index: 8, kind: input, shape index: {}]   ;;  %s3883_s9 = inlined_call_operand.hbm [shape: f32[1,384], index: 9, kind: input, shape index: {}]   ;;  %s3884_s10 = inlined_call_operand.hbm [shape: f32[1,384], index: 10, kind: input, shape index: {}]   ;;  %s3885_s11 = inlined_call_operand.hbm [shape: f32[1,64], index: 11, kind: input, shape index: {}]   ;;  %s3886_s12 = inlined_call_operand.hbm [shape: f32[1,64], index: 12, kind: input, shape index: {}]   ;;  %s3887_s13 = inlined_call_operand.vmem [shape: f32[16,128], index: 13, kind: output, shape index: {}]  }
   0x1   :  { %19 = vsyncpa [#allocation5], 0 }
   0x2   :  { %20 = vsyncpa [#allocation8], 0 }
   0x3   :  { %21 = vsyncpa [#allocation11], 0  ;;  %s2986_s25 = smov [#allocation4]   ;;  %s2987_s27 = smov [#allocation7]  }
   0x4   :  { %s52_s26 = sshll.u32 %s2986_s25, 4  ;;  %s72_s28 = sshll.u32 %s2987_s27, 4  ;;  %s53_s26 = int_to_ptr.vmem [resolvable:$true] %s52_s26  ;;  %s73_s28 = int_to_ptr.vmem [resolvable:$true] %s72_s28 }
   0x5   :  { %s2824_s14 = scalar_lea.hbm %s3881_s7, 112 }
   0x6   :  { %p2825_p0 = scmp.ne.s32.totalorder %s3881_s7, %s2824_s14  ;;  %p2828_p1 = scmp.lt.u32.totalorder %s2824_s14, %s3881_s7 }
   0x8   :  { %p2830_p2 = pnand %p2828_p1, %p2825_p0 }
   0xa   :  { %2833 = shalt.err (!%p2830_p2)
}
   0xb   :  { %s2834_s19 = scalar_lea.vmem %s53_s26, 112  ;;  %s2838_s20 = scalar_lea.vmem %s53_s26, 128 }
   0xc   :  { %p2835_p3 = scmp.ne.s32.totalorder %s53_s26, %s2834_s19  ;;  %p2839_p4 = scmp.lt.s32.totalorder %s53_s26, %s53_s26 }
   0xd   :  { %p2840_p5 = scmp.lt.s32.totalorder %s2838_s20, %s2834_s19 }
   0xf   :  { %p2841_p6 = por %p2840_p5, %p2839_p4 }
  0x11   :  { %p2842_p7 = pnand %p2841_p6, %p2835_p3 }
  0x13   :  { %2845 = shalt.err (!%p2842_p7)
}
  0x14   :  { %55 = dma.hbm_to_vmem [thread:$0]  %s3881_s7, 112, %s53_s26, [#allocation5]  }
  0x15   :  { %s2846_s25 = scalar_lea.hbm %s3883_s9, 48 }
  0x16   :  { %p2847_p8 = scmp.ne.s32.totalorder %s3883_s9, %s2846_s25  ;;  %p2850_p9 = scmp.lt.u32.totalorder %s2846_s25, %s3883_s9 }
  0x18   :  { %p2852_p10 = pnand %p2850_p9, %p2847_p8 }
  0x1a   :  { %2855 = shalt.err (!%p2852_p10)
}
  0x1b   :  { %s2856_s15 = scalar_lea.vmem %s73_s28, 48  ;;  %s2860_s16 = scalar_lea.vmem %s73_s28, 64 }
  0x1c   :  { %p2857_p11 = scmp.ne.s32.totalorder %s73_s28, %s2856_s15  ;;  %p2861_p12 = scmp.lt.s32.totalorder %s73_s28, %s73_s28 }
  0x1d   :  { %p2862_p13 = scmp.lt.s32.totalorder %s2860_s16, %s2856_s15 }
  0x1f   :  { %p2863_p0 = por %p2862_p13, %p2861_p12 }
  0x21   :  { %p2864_p1 = pnand %p2863_p0, %p2857_p11 }
  0x23   :  { %2867 = shalt.err (!%p2864_p1)
}
  0x24   :  { %75 = dma.hbm_to_vmem [thread:$0]  %s3883_s9, 48, %s73_s28, [#allocation8]  }
  0x25   :  { %s2988_s17 = smov [#allocation10]   ;;  %s2989_s19 = smov [#allocation2]  }
  0x26   :  { %s92_s18 = sshll.u32 %s2988_s17, 4  ;;  %s37_s20 = sshll.u32 %s2989_s19, 4  ;;  %s93_s18 = int_to_ptr.vmem [resolvable:$true] %s92_s18  ;;  %s3092_s20 = int_to_ptr.vmem [resolvable:$true] %s37_s20 }
  0x27   :  { %s2868_s23 = scalar_lea.hbm %s3885_s11, 16 }
  0x28   :  { %p2869_p2 = scmp.ne.s32.totalorder %s3885_s11, %s2868_s23  ;;  %p2872_p3 = scmp.lt.u32.totalorder %s2868_s23, %s3885_s11 }
  0x2a   :  { %p2874_p4 = pnand %p2872_p3, %p2869_p2 }
  0x2c   :  { %2877 = shalt.err (!%p2874_p4)
}
  0x2d   :  { %s2878_s9 = scalar_lea.vmem %s93_s18, 16  ;;  %s2882_s28 = scalar_lea.vmem %s93_s18, 32 }
  0x2e   :  { %p2879_p5 = scmp.ne.s32.totalorder %s93_s18, %s2878_s9  ;;  %p2883_p6 = scmp.lt.s32.totalorder %s93_s18, %s93_s18 }
  0x2f   :  { %p2884_p7 = scmp.lt.s32.totalorder %s2882_s28, %s2878_s9 }
  0x31   :  { %p2885_p8 = por %p2884_p7, %p2883_p6 }
  0x33   :  { %p2886_p9 = pnand %p2885_p8, %p2879_p5 }
  0x35   :  { %2889 = shalt.err (!%p2886_p9)
}
  0x36   :  { %95 = dma.hbm_to_vmem [thread:$0]  %s3885_s11, 16, %s93_s18, [#allocation11]  }
  0x37   :  { %s2890_s7 = scalar_lea.hbm %s3879_s5, 512 }
  0x38   :  { %p2891_p10 = scmp.ne.s32.totalorder %s3879_s5, %s2890_s7  ;;  %p2894_p11 = scmp.lt.u32.totalorder %s2890_s7, %s3879_s5 }
  0x3a   :  { %p2896_p12 = pnand %p2894_p11, %p2891_p10 }
  0x3c   :  { %2899 = shalt.err (!%p2896_p12)
}
  0x3d   :  { %s2900_s22 = scalar_lea.vmem %s3092_s20, 512  ;;  %p2905_p0 = scmp.lt.s32.totalorder %s3092_s20, %s3092_s20 }
  0x3e   :  { %p2901_p13 = scmp.ne.s32.totalorder %s3092_s20, %s2900_s22  ;;  %p2906_p1 = scmp.lt.s32.totalorder %s2900_s22, %s2900_s22 }
  0x40   :  { %p2907_p2 = por %p2906_p1, %p2905_p0 }
  0x42   :  { %p2908_p3 = pnand %p2907_p2, %p2901_p13 }
  0x44   :  { %2911 = shalt.err (!%p2908_p3)
}
  0x45   :  { %s2990_s11 = smov 64   ;;  %s2991_s18 = smov 4  }
  0x46   :  { %43 = dma.hbm_to_vmem [thread:$0]  %s3879_s5, 512, %s3092_s20, [#allocation3], %s2990_s11, %s2990_s11, %s2991_s18  }
  0x47   :  { %s2992_s25 = smov [#allocation6]   ;;  %s2993_s29 = smov [#allocation9]  }
  0x48   :  { %s62_s27 = sshll.u32 %s2992_s25, 4  ;;  %s82_s9 = sshll.u32 %s2993_s29, 4  ;;  %s63_s27 = int_to_ptr.vmem [resolvable:$true] %s62_s27  ;;  %s83_s9 = int_to_ptr.vmem [resolvable:$true] %s82_s9 }
  0x49   :  { %s2912_s14 = scalar_lea.hbm %s3882_s8, 112 }
  0x4a   :  { %p2913_p4 = scmp.ne.s32.totalorder %s3882_s8, %s2912_s14  ;;  %p2916_p5 = scmp.lt.u32.totalorder %s2912_s14, %s3882_s8 }
  0x4c   :  { %p2918_p6 = pnand %p2916_p5, %p2913_p4 }
  0x4e   :  { %2921 = shalt.err (!%p2918_p6)
}
  0x4f   :  { %s2922_s5 = scalar_lea.vmem %s63_s27, 112  ;;  %s2926_s20 = scalar_lea.vmem %s63_s27, 128 }
  0x50   :  { %p2923_p7 = scmp.ne.s32.totalorder %s63_s27, %s2922_s5  ;;  %p2927_p8 = scmp.lt.s32.totalorder %s63_s27, %s63_s27 }
  0x51   :  { %p2928_p9 = scmp.lt.s32.totalorder %s2926_s20, %s2922_s5 }
  0x53   :  { %p2929_p10 = por %p2928_p9, %p2927_p8 }
  0x55   :  { %p2930_p11 = pnand %p2929_p10, %p2923_p7 }
  0x57   :  { %2933 = shalt.err (!%p2930_p11)
}
  0x58   :  { %65 = dma.hbm_to_vmem [thread:$0]  %s3882_s8, 112, %s63_s27, [#allocation5]  }
  0x59   :  { %s2934_s11 = scalar_lea.hbm %s3884_s10, 48 }
  0x5a   :  { %p2935_p12 = scmp.ne.s32.totalorder %s3884_s10, %s2934_s11  ;;  %p2938_p13 = scmp.lt.u32.totalorder %s2934_s11, %s3884_s10 }
  0x5c   :  { %p2940_p0 = pnand %p2938_p13, %p2935_p12 }
  0x5e   :  { %2943 = shalt.err (!%p2940_p0)
}
  0x5f   :  { %s2944_s29 = scalar_lea.vmem %s83_s9, 48  ;;  %s2948_s28 = scalar_lea.vmem %s83_s9, 64 }
  0x60   :  { %p2945_p1 = scmp.ne.s32.totalorder %s83_s9, %s2944_s29  ;;  %p2949_p2 = scmp.lt.s32.totalorder %s83_s9, %s83_s9 }
  0x61   :  { %p2950_p3 = scmp.lt.s32.totalorder %s2948_s28, %s2944_s29 }
  0x63   :  { %p2951_p4 = por %p2950_p3, %p2949_p2 }
  0x65   :  { %p2952_p5 = pnand %p2951_p4, %p2945_p1 }
  0x67   :  { %2955 = shalt.err (!%p2952_p5)
}
  0x68   :  { %85 = dma.hbm_to_vmem [thread:$0]  %s3884_s10, 48, %s83_s9, [#allocation8]  }
  0x69   :  { %s2994_s30 = smov [#allocation12]   ;;  %s2956_s7 = scalar_lea.hbm %s3886_s12, 16 }
  0x6a   :  { %s102_s14 = sshll.u32 %s2994_s30, 4  ;;  %p2957_p6 = scmp.ne.s32.totalorder %s3886_s12, %s2956_s7  ;;  %s103_s14 = int_to_ptr.vmem [resolvable:$true] %s102_s14 }
  0x6b   :  { %p2960_p7 = scmp.lt.u32.totalorder %s2956_s7, %s3886_s12 }
  0x6d   :  { %p2962_p8 = pnand %p2960_p7, %p2957_p6 }
  0x6f   :  { %2965 = shalt.err (!%p2962_p8)
}
  0x70   :  { %s2966_s19 = scalar_lea.vmem %s103_s14, 16  ;;  %s2970_s10 = scalar_lea.vmem %s103_s14, 32 }
  0x71   :  { %p2967_p9 = scmp.ne.s32.totalorder %s103_s14, %s2966_s19  ;;  %p2971_p10 = scmp.lt.s32.totalorder %s103_s14, %s103_s14 }
  0x72   :  { %p2972_p11 = scmp.lt.s32.totalorder %s2970_s10, %s2966_s19 }
  0x74   :  { %p2973_p12 = por %p2972_p11, %p2971_p10 }
  0x76   :  { %p2974_p13 = pnand %p2973_p12, %p2967_p9 }
  0x78   :  { %2977 = shalt.err (!%p2974_p13)
}
  0x79   :  { %105 = dma.hbm_to_vmem [thread:$0]  %s3886_s12, 16, %s103_s14, [#allocation11]  }
  0x7a   :  { %2978 = dma.done.wait [#allocation3], 512  }
  0x7b   :  { %2979 = vsyncadd [#allocation3], 4294966784 }
  0x7c   :  { %2980 = dma.done.wait [#allocation5], 224  }
  0x7d   :  { %2981 = vsyncadd [#allocation5], 4294967072 }
  0x7e   :  { %2982 = dma.done.wait [#allocation8], 96  }
  0x7f   :  { %2983 = vsyncadd [#allocation8], 4294967200 }
  0x80   :  { %2984 = dma.done.wait [#allocation11], 32  }
  0x81   :  { %2985 = vsyncadd [#allocation11], 4294967264  ;;  %v2995_v0 = vmov 0   ;;  %v2592_v1 = vld [vmem:[%s3875_s1 + $0x4] ss:$12 sps:$4 sm:$0xff]   ;;  %v152_v8 = vlaneseq  ;;  %v142_v27 = vld [vmem:[%s3874_s0 + $0x68] sm:$0xff] }
  0x82   :  { %1540 = vmatprep.mubr.bf16.mxu1 %v2995_v0  ;;  %v2594_v2 = vld [vmem:[%s3875_s1] ss:$12 sps:$4 sm:$0xff]   ;;  %1379 = vmatprep.subr.bf16.mxu0 %v2592_v1  ;;  %v2595_v3 = vld [vmem:[%s3875_s1 + $0x1c] ss:$12 sps:$4 sm:$0xff]   ;;  %v2597_v4 = vld [vmem:[%s3875_s1 + $0x18] ss:$12 sps:$4 sm:$0xff]  }
  0x83   :  { %1380 = vmatpush1.bf16.msra.mxu0 %v2594_v2  ;;  %v2598_v5 = vld [vmem:[%s3875_s1 + $0x34] ss:$12 sps:$4 sm:$0xff]   ;;  %v2600_v6 = vld [vmem:[%s3875_s1 + $0x30] ss:$12 sps:$4 sm:$0xff]   ;;  %v2601_v7 = vld [vmem:[%s3875_s1 + $0x4c] ss:$12 sps:$4 sm:$0xff]  }
  0x84   :  { %1381 = vmatprep.subr.bf16.mxu0 %v2595_v3  ;;  %v2603_v9 = vld [vmem:[%s3875_s1 + $0x48] ss:$12 sps:$4 sm:$0xff]   ;;  %v2604_v10 = vld [vmem:[%s3875_s1 + $0x64] ss:$12 sps:$4 sm:$0xff]   ;;  %v3187_v11 = vshrl.u32 %v152_v8, 7  ;;  %vm1375_vm0 = vcmask 130048  }
  0x85   :  { %v2606_v12 = vld [vmem:[%s3875_s1 + $0x60] ss:$12 sps:$4 sm:$0xff]   ;;  %v2607_v13 = vld [vmem:[%s3875_s1 + $0x7c] ss:$12 sps:$4 sm:$0xff]   ;;  %v2630_v14 = vld [vmem:[%s3875_s1 + $0x484] ss:$12 sps:$4 sm:$0xff]  }
  0x86   :  { %v2633_v15 = vld [vmem:[%s3875_s1 + $0x480] ss:$12 sps:$4 sm:$0xff]   ;;  %v178_v16 = vsub.s32 6, %v3187_v11  ;;  %v3203_v17 = vsub.s32 1, %v3187_v11  ;;  %v2609_v18 = vld [vmem:[%s3875_s1 + $0x78] ss:$12 sps:$4 sm:$0xff]   ;;  %1508 = vmatprep.subr.bf16.mxu1 %v2630_v14 }
  0x87   :  { %1382 = vmatpush1.bf16.msra.mxu0 %v2597_v4  ;;  %v2610_v19 = vld [vmem:[%s3875_s1 + $0x94] ss:$12 sps:$4 sm:$0xff]   ;;  %1509 = vmatpush1.bf16.msra.mxu1 %v2633_v15  ;;  %v2612_v21 = vld [vmem:[%s3875_s1 + $0x90] ss:$12 sps:$4 sm:$0xff]   ;;  %v3220_v23 = vld [vmem:[#allocation6] sm:$0x7f] }
  0x88   :  { %1383 = vmatprep.subr.bf16.mxu0 %v2598_v5  ;;  %v2636_v20 = vld [vmem:[%s3875_s1 + $0xc8] ss:$12 sps:$4 sm:$0xff]   ;;  %v179_v24 = vrot.slane %v3220_v23, %v178_v16  ;;  %v3223_v25 = vld [vmem:[#allocation4] sm:$0x7f]  ;;  %v159_v26 = vrot.slane %v3220_v23, %v3203_v17  ;;  %v3231_v28 = vsub.s32 0, %v3187_v11  ;;  %v174_v41 = vsub.s32 5, %v3187_v11 }
  0x89   :  { %v135_v22 = vld [vmem:[%s3874_s0 + $0x30] sm:$0xff]  ;;  %2422 = vmatprep.subr.bf16.mxu1 %v2636_v20  ;;  %v223_v29 = vrot.slane %v3223_v25, %v178_v16  ;;  %v203_v30 = vrot.slane %v3223_v25, %v3203_v17  ;;  %v2613_v31 = vld [vmem:[%s3875_s1 + $0xac] ss:$12 sps:$4 sm:$0xff]   ;;  %v170_v44 = vsub.s32 4, %v3187_v11  ;;  %v137_v51 = vld [vmem:[%s3874_s0 + $0x40] sm:$0xff]  ;;  %vm2997_vm8 = vmmov 0  }
  0x8a   :  { %v193_v32 = vpack.c.bf16 %v179_v24, %v179_v24  ;;  %v188_v33 = vpack.c.bf16 %v159_v26, %v159_v26  ;;  %v149_v36 = vpack.c.bf16 %v142_v27, %v135_v22  ;;  %v2615_v39 = vld [vmem:[%s3875_s1 + $0xa8] ss:$12 sps:$4 sm:$0xff]   ;;  %v2616_v42 = vld [vmem:[%s3875_s1 + $0xc4] ss:$12 sps:$4 sm:$0xff]   ;;  %v2618_v52 = vld [vmem:[%s3875_s1 + $0xc0] ss:$12 sps:$4 sm:$0xff]   ;;  %v3263_v55 = vrot.slane %v3220_v23, %v174_v41 }
  0x8b   :  { %1384 = vmatpush1.bf16.msra.mxu0 %v2600_v6  ;;  %v237_v34 = vpack.c.bf16 %v223_v29, %v223_v29  ;;  %v232_v35 = vpack.c.bf16 %v203_v30, %v203_v30  ;;  %v130_v50 = vld [vmem:[%s3874_s0 + $0x8] sm:$0xff]  ;;  %v3266_v56 = vrot.slane %v3223_v25, %v174_v41  ;;  %v3269_v59 = vrot.slane %v3220_v23, %v170_v44  ;;  %v2621_v2 = vld [vmem:[%s3875_s1 + $0xd8] ss:$12 sps:$4 sm:$0xff]   ;;  %v2622_v6 = vld [vmem:[%s3875_s1 + $0xf4] ss:$12 sps:$4 sm:$0xff]  }
  0x8c   :  { %1385 = vmatprep.subr.bf16.mxu0 %v2601_v7  ;;  %v281_v37 = vpack.i.b16 %v193_v32, %v193_v32  ;;  %v246_v38 = vpack.i.b16 %v188_v33, %v188_v33  ;;  %v2619_v53 = vld [vmem:[%s3875_s1 + $0xdc] ss:$12 sps:$4 sm:$0xff]   ;;  %v144_v54 = vpack.c.bf16 %v137_v51, %v130_v50  ;;  %v2641_v1 = vld [vmem:[%s3875_s1 + $0xe0] ss:$12 sps:$4 sm:$0xff]   ;;  %v155_v7 = vrot.slane %v3220_v23, %v3231_v28  ;;  %v2628_v20 = vld [vmem:[%s3875_s1 + $0x124] ss:$12 sps:$4 sm:$0xff]  }
  0x8d   :  { %v344_v40 = vpack.i.b16 %v237_v34, %v237_v34  ;;  %v309_v46 = vpack.i.b16 %v232_v35, %v232_v35  ;;  %v2638_v60 = vld [vmem:[%s3875_s1 + $0x8] ss:$12 sps:$4 sm:$0xff]   ;;  %v2643_v8 = vld [vmem:[%s3875_s1 + $0x20] ss:$12 sps:$4 sm:$0xff]   ;;  %v136_v22 = vld [vmem:[%s3874_s0 + $0x38] sm:$0xff]  ;;  %v199_v24 = vrot.slane %v3223_v25, %v3231_v28  ;;  %vm2167_vm12 = vcmask 523264  }
  0x8e   :  { %v286_v43 = vrot.slane %v281_v37, %v3231_v28  ;;  %v251_v45 = vrot.slane %v246_v38, %v3231_v28  ;;  %v2625_v14 = vld [vmem:[%s3875_s1 + $0x10c] ss:$12 sps:$4 sm:$0xff]   ;;  %v187_v15 = vpack.c.bf16 %v155_v7, %v155_v7  ;;  %v2627_v16 = vld [vmem:[%s3875_s1 + $0x108] ss:$12 sps:$4 sm:$0xff]   ;;  %v2653_v27 = vld [vmem:[%s3875_s1 + $0x50] ss:$12 sps:$4 sm:$0xff]  }
  0x8f   :  { %1386 = vmatpush1.bf16.msra.mxu0 %v2603_v9  ;;  %v349_v48 = vrot.slane %v344_v40, %v3231_v28  ;;  %v314_v62 = vrot.slane %v309_v46, %v3231_v28  ;;  %v2646_v9 = vld [vmem:[%s3875_s1 + $0xf8] ss:$12 sps:$4 sm:$0xff]   ;;  %v2657_v29 = vld [vmem:[%s3875_s1 + $0x128] ss:$12 sps:$4 sm:$0xff]   ;;  %v2632_v30 = vld [vmem:[%s3875_s1 + $0x120] ss:$12 sps:$4 sm:$0xff]   ;;  %v231_v33 = vpack.c.bf16 %v199_v24, %v199_v24 }
  0x90   :  { %1387 = vmatprep.subr.bf16.mxu0 %v2604_v10  ;;  %v293_v47 = vsub.bf16 %v149_v36, %v286_v43  ;;  %v363_v49 = vadd.bf16 %v286_v43, %v149_v36  ;;  %v288_v61 = vsub.bf16 %v144_v54, %v251_v45  ;;  %v358_v63 = vadd.bf16 %v251_v45, %v144_v54  ;;  %v2658_v35 = vld [vmem:[%s3875_s1 + $0x68] ss:$12 sps:$4 sm:$0xff]   ;;  %v2637_v37 = vld [vmem:[%s3875_s1 + $0x138] ss:$12 sps:$4 sm:$0xff]   ;;  %v2663_v41 = vld [vmem:[%s3875_s1 + $0x80] ss:$12 sps:$4 sm:$0xff]  }
  0x91   :  { %v239_v26 = vpack.i.b16 %v187_v15, %v187_v15  ;;  %v2639_v38 = vld [vmem:[%s3875_s1 + $0x154] ss:$12 sps:$4 sm:$0xff]   ;;  %v302_v40 = vpack.i.b16 %v231_v33, %v231_v33  ;;  %v2667_v43 = vld [vmem:[%s3875_s1 + $0x158] ss:$12 sps:$4 sm:$0xff]   ;;  %v2672_v50 = vld [vmem:[%s3875_s1 + $0x170] ss:$12 sps:$4 sm:$0xff]  }
  0x92   :  { %v300_v57 = vand.u32 2147450879, %v293_v47  ;;  %v370_v58 = vmul.bf16 1056980736, %v363_v49  ;;  %v295_v4 = vand.u32 2147450879, %v288_v61 }
  0x93   :  { %1388 = vmatpush1.bf16.msra.mxu0 %v2606_v12  ;;  %v365_v5 = vmul.bf16 1056980736, %v358_v63  ;;  %v3297_v12 = vrot.slane %v3223_v25, %v170_v44  ;;  %v244_v34 = vrot.slane %v239_v26, %v3231_v28  ;;  %v2644_v44 = vld [vmem:[%s3875_s1 + $0x16c] ss:$12 sps:$4 sm:$0xff]   ;;  %v307_v47 = vrot.slane %v302_v40, %v3231_v28  ;;  %v2678_v63 = vld [vmem:[%s3875_s1 + $0x188] ss:$12 sps:$4 sm:$0xff]  }
  0x94   :  { %1389 = vmatprep.subr.bf16.mxu0 %v2607_v13  ;;  %vm356_vm1 = vcmp.lt.bf16.partialorder %v300_v57, %v349_v48  ;;  %vm351_vm2 = vcmp.lt.bf16.partialorder %v295_v4, %v314_v62  ;;  %v2624_v13 = vld [vmem:[%s3875_s1 + $0xf0] ss:$12 sps:$4 sm:$0xff]   ;;  %v2647_v48 = vld [vmem:[%s3875_s1 + $0x168] ss:$12 sps:$4 sm:$0xff]   ;;  %v2668_v49 = vld [vmem:[%s3875_s1 + $0x98] ss:$12 sps:$4 sm:$0xff]  }
  0x95   :  { %v3281_v3 = vsel %vm356_vm1, %v370_v58, %v149_v36  ;;  %v372_v10 = vsel %vm351_vm2, %v365_v5, %v144_v54  ;;  %v2662_v36 = vld [vmem:[%s3875_s1 + $0x140] ss:$12 sps:$4 sm:$0xff]   ;;  %v2673_v54 = vld [vmem:[%s3875_s1 + $0xb0] ss:$12 sps:$4 sm:$0xff]   ;;  %v2677_v57 = vld [vmem:[%s3875_s1 + $0x248] ss:$12 sps:$4 sm:$0xff]  }
  0x96   :  { %2389 = vmatmul.mubr.msk.bf16.vlgmr.msra.gmra.mrb[0].mxu1 %vm1375_vm0, %v3281_v3  ;;  %1411 = vmatprep.mubr.bf16.mxu0 %v372_v10  ;;  %v2649_v58 = vld [vmem:[%s3875_s1 + $0x180] ss:$12 sps:$4 sm:$0xff]   ;;  %v3386_v61 = vsub.s32 2, %v3187_v11  ;;  %v2656_v62 = vld [vmem:[%s3875_s1 + $0x19c] ss:$12 sps:$4 sm:$0xff]  }
  0x97   :  { %1390 = vmatpush1.bf16.msra.mxu0 %v2609_v18  ;;  %2423 = vmatpush3.bf16.msra.mxu1 %v2638_v60  ;;  %v2648_v18 = vld [vmem:[%s3875_s1 + $0x38] ss:$12 sps:$4 sm:$0xff]   ;;  %v2661_v5 = vld [vmem:[%s3875_s1 + $0x1b4] ss:$12 sps:$4 sm:$0xff]   ;;  %v2693_v26 = vld [vmem:[%s3875_s1 + $0x1d0] ss:$12 sps:$4 sm:$0xff]  }
  0x98   :  { %1391 = vmatprep.subr.bf16.mxu0 %v2610_v19  ;;  %2424 = vmatprep.subr.bf16.mxu1 %v2641_v1  ;;  %v2652_v19 = vld [vmem:[%s3875_s1 + $0x110] ss:$12 sps:$4 sm:$0xff]   ;;  %v163_v4 = vrot.slane %v3220_v23, %v3386_v61  ;;  %v2688_v15 = vld [vmem:[%s3875_s1 + $0x1b8] ss:$12 sps:$4 sm:$0xff]   ;;  %v2669_v24 = vld [vmem:[%s3875_s1 + $0x1e0] ss:$12 sps:$4 sm:$0xff]  }
  0x99   :  { %1583 = vmatprep.mubr.bf16.mxu1 %v372_v10  ;;  %v2659_v10 = vld [vmem:[%s3875_s1 + $0x1b0] ss:$12 sps:$4 sm:$0xff]  }
  0x9b   :  { %1392 = vmatpush1.bf16.msra.mxu0 %v2612_v21  ;;  %2425 = vmatpush3.bf16.msra.mxu1 %v2643_v8  ;;  %v129_v21 = vld [vmem:[%s3874_s0] sm:$0xff] }
  0x9c   :  { %1393 = vmatprep.subr.bf16.mxu0 %v2613_v31  ;;  %2426 = vmatprep.subr.bf16.mxu1 %v2646_v9  ;;  %v2634_v31 = vld [vmem:[%s3875_s1 + $0x13c] ss:$12 sps:$4 sm:$0xff]   ;;  %v143_v32 = vpack.c.bf16 %v136_v22, %v129_v21  ;;  %v2687_v9 = vld [vmem:[%s3875_s1 + $0x278] ss:$12 sps:$4 sm:$0xff]  }
  0x9d   :  { %v2671_v22 = vld [vmem:[%s3875_s1 + $0x1e4] ss:$12 sps:$4 sm:$0xff]  }
  0x9e   :  { %v357_v45 = vadd.bf16 %v244_v34, %v143_v32 }
  0x9f   :  { %1394 = vmatpush1.bf16.msra.mxu0 %v2615_v39  ;;  %2427 = vmatpush3.bf16.msra.mxu1 %v2648_v18  ;;  %v287_v39 = vsub.bf16 %v143_v32, %v244_v34  ;;  %v2676_v34 = vld [vmem:[%s3875_s1 + $0x1fc] ss:$12 sps:$4 sm:$0xff]  }
  0xa0   :  { %1395 = vmatprep.subr.bf16.mxu0 %v2616_v42  ;;  %2428 = vmatprep.subr.bf16.mxu1 %v2652_v19  ;;  %v2642_v42 = vld [vmem:[%s3875_s1 + $0x150] ss:$12 sps:$4 sm:$0xff]   ;;  %v364_v51 = vmul.bf16 1056980736, %v357_v45  ;;  %v2702_v45 = vld [vmem:[%s3875_s1 + $0x2c0] ss:$12 sps:$4 sm:$0xff]  }
  0xa1   :  { %v294_v46 = vand.u32 2147450879, %v287_v39  ;;  %v2698_v39 = vld [vmem:[%s3875_s1 + $0x1e8] ss:$12 sps:$4 sm:$0xff]  }
  0xa3   :  { %1396 = vmatpush1.bf16.msra.mxu0 %v2618_v52  ;;  %2429 = vmatpush3.bf16.msra.mxu1 %v2653_v27  ;;  %v2651_v52 = vld [vmem:[%s3875_s1 + $0x184] ss:$12 sps:$4 sm:$0xff]   ;;  %vm350_vm3 = vcmp.lt.bf16.partialorder %v294_v46, %v307_v47  ;;  %v2697_v27 = vld [vmem:[%s3875_s1 + $0x2a8] ss:$12 sps:$4 sm:$0xff]  }
  0xa4   :  { %1397 = vmatprep.subr.bf16.mxu0 %v2619_v53  ;;  %2430 = vmatprep.subr.bf16.mxu1 %v2657_v29  ;;  %v166_v53 = vsub.s32 3, %v3187_v11  ;;  %v371_v60 = vsel %vm350_vm3, %v364_v51, %v143_v32  ;;  %v2654_v11 = vld [vmem:[%s3875_s1 + $0x198] ss:$12 sps:$4 sm:$0xff]   ;;  %v139_v32 = vld [vmem:[%s3874_s0 + $0x50] sm:$0xff] }
  0xa5   :  { %v2681_v51 = vld [vmem:[%s3875_s1 + $0x214] ss:$12 sps:$4 sm:$0xff]  }
  0xa6   :  { %v167_v1 = vrot.slane %v3220_v23, %v166_v53  ;;  %v211_v8 = vrot.slane %v3223_v25, %v166_v53  ;;  %v207_v23 = vrot.slane %v3223_v25, %v3386_v61  ;;  %v2692_v25 = vld [vmem:[%s3875_s1 + $0x290] ss:$12 sps:$4 sm:$0xff]  }
  0xa7   :  { %1398 = vmatpush1.bf16.msra.mxu0 %v2621_v2  ;;  %2431 = vmatpush3.bf16.msra.mxu1 %v2658_v35  ;;  %v2682_v2 = vld [vmem:[%s3875_s1 + $0x260] ss:$12 sps:$4 sm:$0xff]  }
  0xa8   :  { %1399 = vmatprep.subr.bf16.mxu0 %v2622_v6  ;;  %2432 = vmatprep.subr.bf16.mxu1 %v2662_v36  ;;  %v2683_v6 = vld [vmem:[%s3875_s1 + $0x1a0] ss:$12 sps:$4 sm:$0xff]   ;;  %v190_v7 = vpack.c.bf16 %v167_v1, %v167_v1  ;;  %v233_v19 = vpack.c.bf16 %v207_v23, %v207_v23  ;;  %v131_v36 = vld [vmem:[%s3874_s0 + $0x10] sm:$0xff]  ;;  %v2708_v1 = vld [vmem:[%s3875_s1 + $0x218] ss:$12 sps:$4 sm:$0xff]   ;;  %v192_v23 = vpack.c.bf16 %v3263_v55, %v3263_v55 }
  0xa9   :  { %v2723_v55 = vld [vmem:[%s3875_s1 + $0x320] ss:$12 sps:$4 sm:$0xff]  }
  0xaa   :  { %v260_v18 = vpack.i.b16 %v190_v7, %v190_v7  ;;  %v316_v33 = vpack.i.b16 %v233_v19, %v233_v19  ;;  %v2689_v7 = vld [vmem:[%s3875_s1 + $0x240] ss:$12 sps:$4 sm:$0xff]   ;;  %v2699_v19 = vld [vmem:[%s3875_s1 + $0x270] ss:$12 sps:$4 sm:$0xff]  }
  0xab   :  { %1400 = vmatpush1.bf16.msra.mxu0 %v2624_v13  ;;  %2433 = vmatpush3.bf16.msra.mxu1 %v2663_v41  ;;  %v189_v13 = vpack.c.bf16 %v163_v4, %v163_v4  ;;  %v2691_v4 = vld [vmem:[%s3875_s1 + $0x244] ss:$12 sps:$4 sm:$0xff]  }
  0xac   :  { %1401 = vmatprep.subr.bf16.mxu0 %v2625_v14  ;;  %2434 = vmatprep.subr.bf16.mxu1 %v2667_v43  ;;  %v2666_v14 = vld [vmem:[%s3875_s1 + $0x1cc] ss:$12 sps:$4 sm:$0xff]   ;;  %v265_v29 = vrot.slane %v260_v18, %v3231_v28  ;;  %v321_v46 = vrot.slane %v316_v33, %v3231_v28  ;;  %v274_v18 = vpack.i.b16 %v192_v23, %v192_v23  ;;  %v2760_v23 = vld [vmem:[%s3875_s1 + $0x488] ss:$12 sps:$4 sm:$0xff]  }
  0xad   :  { %v253_v21 = vpack.i.b16 %v189_v13, %v189_v13  ;;  %v2694_v13 = vld [vmem:[%s3875_s1 + $0x258] ss:$12 sps:$4 sm:$0xff]  }
  0xaf   :  { %1402 = vmatpush1.bf16.msra.mxu0 %v2627_v16  ;;  %2435 = vmatpush3.bf16.msra.mxu1 %v2668_v49  ;;  %v234_v16 = vpack.c.bf16 %v211_v8, %v211_v8  ;;  %v2696_v8 = vld [vmem:[%s3875_s1 + $0x25c] ss:$12 sps:$4 sm:$0xff]  }
  0xb0   :  { %1403 = vmatprep.subr.bf16.mxu0 %v2628_v20  ;;  %2436 = vmatprep.subr.bf16.mxu1 %v2672_v50  ;;  %v2664_v20 = vld [vmem:[%s3875_s1 + $0x1c8] ss:$12 sps:$4 sm:$0xff]  }
  0xb3   :  { %1404 = vmatpush1.bf16.msra.mxu0 %v2632_v30  ;;  %2437 = vmatpush3.bf16.msra.mxu1 %v2673_v54  ;;  %v323_v30 = vpack.i.b16 %v234_v16, %v234_v16  ;;  %v236_v16 = vpack.c.bf16 %v3266_v56, %v3266_v56  ;;  %v2728_v56 = vld [vmem:[%s3875_s1 + $0x338] ss:$12 sps:$4 sm:$0xff]  }
  0xb4   :  { %1405 = vmatprep.subr.bf16.mxu0 %v2634_v31  ;;  %2444 = vmatprep.subr.bf16.mxu1 %v2677_v57  ;;  %v132_v31 = vld [vmem:[%s3874_s0 + $0x18] sm:$0xff] }
  0xb5   :  { %v146_v35 = vpack.c.bf16 %v139_v32, %v132_v31  ;;  %v328_v41 = vrot.slane %v323_v30, %v3231_v28  ;;  %v2707_v57 = vld [vmem:[%s3875_s1 + $0x2d8] ss:$12 sps:$4 sm:$0xff]   ;;  %v2704_v30 = vld [vmem:[%s3875_s1 + $0x288] ss:$12 sps:$4 sm:$0xff]  }
  0xb6   :  { %1584 = vmatmul.mubr.bf16.vlgmr.msra.gmra.mrb[4].mxu1 %v371_v60  ;;  %v2711_v31 = vld [vmem:[%s3875_s1 + $0x2a4] ss:$12 sps:$4 sm:$0xff]  }
  0xb7   :  { %1406 = vmatpush1.bf16.msra.mxu0 %v2637_v37  ;;  %2445 = vmatpush3.bf16.msra.mxu1 %v2678_v63  ;;  %v258_v37 = vrot.slane %v253_v21, %v3231_v28  ;;  %v290_v40 = vsub.bf16 %v146_v35, %v265_v29 }
  0xb8   :  { %1407 = vmatprep.subr.bf16.mxu0 %v2639_v38  ;;  %2446 = vmatprep.subr.bf16.mxu1 %v2682_v2  ;;  %v138_v38 = vld [vmem:[%s3874_s0 + $0x48] sm:$0xff]  ;;  %v2712_v2 = vld [vmem:[%s3875_s1 + $0x2f0] ss:$12 sps:$4 sm:$0xff]  }
  0xb9   :  { %v145_v43 = vpack.c.bf16 %v138_v38, %v131_v36  ;;  %v297_v47 = vand.u32 2147450879, %v290_v40  ;;  %v2709_v36 = vld [vmem:[%s3875_s1 + $0x2a0] ss:$12 sps:$4 sm:$0xff]  }
  0xbb   :  { %1408 = vmatpush1.bf16.msra.mxu0 %v2642_v42  ;;  %2447 = vmatpush3.bf16.msra.mxu1 %v2683_v6  ;;  %v360_v42 = vadd.bf16 %v265_v29, %v146_v35  ;;  %v289_v49 = vsub.bf16 %v145_v43, %v258_v37  ;;  %v359_v50 = vadd.bf16 %v258_v37, %v145_v43  ;;  %v2717_v6 = vld [vmem:[%s3875_s1 + $0x3c8] ss:$12 sps:$4 sm:$0xff]   ;;  %v2733_v37 = vld [vmem:[%s3875_s1 + $0x350] ss:$12 sps:$4 sm:$0xff]  }
  0xbc   :  { %1409 = vmatprep.subr.bf16.mxu0 %v2644_v44  ;;  %2448 = vmatprep.subr.bf16.mxu1 %v2687_v9  ;;  %v2674_v44 = vld [vmem:[%s3875_s1 + $0x1f8] ss:$12 sps:$4 sm:$0xff]   ;;  %vm353_vm4 = vcmp.lt.bf16.partialorder %v297_v47, %v328_v41  ;;  %v2718_v9 = vld [vmem:[%s3875_s1 + $0x308] ss:$12 sps:$4 sm:$0xff]  }
  0xbd   :  { %v296_v53 = vand.u32 2147450879, %v289_v49  ;;  %v366_v54 = vmul.bf16 1056980736, %v359_v50  ;;  %v2738_v49 = vld [vmem:[%s3875_s1 + $0x368] ss:$12 sps:$4 sm:$0xff]  }
  0xbf   :  { %1410 = vmatpush1.bf16.msra.mxu0 %v2647_v48  ;;  %2449 = vmatpush3.bf16.msra.mxu1 %v2688_v15  ;;  %v367_v48 = vmul.bf16 1056980736, %v360_v42  ;;  %vm352_vm5 = vcmp.lt.bf16.partialorder %v296_v53, %v321_v46  ;;  %v2701_v15 = vld [vmem:[%s3875_s1 + $0x274] ss:$12 sps:$4 sm:$0xff]  }
  0xc0   :  { %1422 = vmatprep.subr.bf16.mxu0 %v2651_v52  ;;  %2450 = vmatprep.subr.bf16.mxu1 %v2692_v25  ;;  %v2703_v52 = vld [vmem:[%s3875_s1 + $0x200] ss:$12 sps:$4 sm:$0xff]   ;;  %v3485_v63 = vsel %vm352_vm5, %v366_v54, %v145_v43  ;;  %v235_v25 = vpack.c.bf16 %v3297_v12, %v3297_v12  ;;  %v2732_v12 = vld [vmem:[%s3875_s1 + $0x410] ss:$12 sps:$4 sm:$0xff]   ;;  %v2737_v42 = vld [vmem:[%s3875_s1 + $0x428] ss:$12 sps:$4 sm:$0xff]  }
  0xc1   :  { %v2714_v54 = vld [vmem:[%s3875_s1 + $0x2b8] ss:$12 sps:$4 sm:$0xff]  }
  0xc2   :  { %1412 = vmatmul.mubr.bf16.vlgmr.msra.gmra.mrb[0].mxu0 %v371_v60  ;;  %v2679_v60 = vld [vmem:[%s3875_s1 + $0x210] ss:$12 sps:$4 sm:$0xff]   ;;  %v330_v29 = vpack.i.b16 %v235_v25, %v235_v25  ;;  %v2754_v25 = vld [vmem:[%s3875_s1 + $0x378] ss:$12 sps:$4 sm:$0xff]  }
  0xc3   :  { %1423 = vmatpush1.bf16.msra.mxu0 %v2649_v58  ;;  %2451 = vmatpush3.bf16.msra.mxu1 %v2693_v26  ;;  %v374_v58 = vsel %vm353_vm4, %v367_v48, %v146_v35  ;;  %v134_v26 = vld [vmem:[%s3874_s0 + $0x28] sm:$0xff]  ;;  %v140_v35 = vld [vmem:[%s3874_s0 + $0x58] sm:$0xff] }
  0xc4   :  { %1424 = vmatprep.subr.bf16.mxu0 %v2656_v62  ;;  %2452 = vmatprep.subr.bf16.mxu1 %v2697_v27  ;;  %v2686_v62 = vld [vmem:[%s3875_s1 + $0x22c] ss:$12 sps:$4 sm:$0xff]   ;;  %v141_v27 = vld [vmem:[%s3874_s0 + $0x60] sm:$0xff]  ;;  %v335_v43 = vrot.slane %v330_v29, %v3231_v28  ;;  %v2716_v48 = vld [vmem:[%s3875_s1 + $0x2bc] ss:$12 sps:$4 sm:$0xff]  }
  0xc5   :  { %1624 = vmatprep.mubr.bf16.mxu1 %v374_v58  ;;  %1454 = vmatprep.mubr.bf16.mxu0 %v374_v58  ;;  %v148_v32 = vpack.c.bf16 %v141_v27, %v134_v26  ;;  %v2772_v26 = vld [vmem:[%s3875_s1 + $0x3f4] ss:$12 sps:$4 sm:$0xff]   ;;  %v2770_v27 = vld [vmem:[%s3875_s1 + $0x3f0] ss:$12 sps:$4 sm:$0xff]   ;;  %v2775_v29 = vld [vmem:[%s3875_s1 + $0x40c] ss:$12 sps:$4 sm:$0xff]  }
  0xc7   :  { %1425 = vmatpush1.bf16.msra.mxu0 %v2654_v11  ;;  %2453 = vmatpush3.bf16.msra.mxu1 %v2698_v39  ;;  %v2684_v11 = vld [vmem:[%s3875_s1 + $0x228] ss:$12 sps:$4 sm:$0xff]  }
  0xc8   :  { %1426 = vmatprep.subr.bf16.mxu0 %v2661_v5  ;;  %2454 = vmatprep.subr.bf16.mxu1 %v2702_v45  ;;  %v2713_v5 = vld [vmem:[%s3875_s1 + $0x230] ss:$12 sps:$4 sm:$0xff]  }
  0xcb   :  { %1427 = vmatpush1.bf16.msra.mxu0 %v2659_v10  ;;  %2455 = vmatpush3.bf16.msra.mxu1 %v2703_v52  ;;  %v2722_v10 = vld [vmem:[%s3875_s1 + $0x3e0] ss:$12 sps:$4 sm:$0xff]  }
  0xcc   :  { %1428 = vmatprep.subr.bf16.mxu0 %v2666_v14  ;;  %2456 = vmatprep.subr.bf16.mxu1 %v2707_v57  ;;  %v191_v14 = vpack.c.bf16 %v3269_v59, %v3269_v59  ;;  %v2727_v59 = vld [vmem:[%s3875_s1 + $0x3f8] ss:$12 sps:$4 sm:$0xff]   ;;  %v2742_v52 = vld [vmem:[%s3875_s1 + $0x440] ss:$12 sps:$4 sm:$0xff]  }
  0xcd   :  { %v2721_v57 = vld [vmem:[%s3875_s1 + $0x2d4] ss:$12 sps:$4 sm:$0xff]  }
  0xce   :  { %v267_v21 = vpack.i.b16 %v191_v14, %v191_v14  ;;  %v2996_v14 = vmov 0.0  }
  0xcf   :  { %1429 = vmatpush1.bf16.msra.mxu0 %v2664_v20  ;;  %2457 = vmatpush3.bf16.msra.mxu1 %v2708_v1  ;;  %v2706_v20 = vld [vmem:[%s3875_s1 + $0x28c] ss:$12 sps:$4 sm:$0xff]   ;;  %v2719_v1 = vld [vmem:[%s3875_s1 + $0x2d0] ss:$12 sps:$4 sm:$0xff]  }
  0xd0   :  { %1430 = vmatprep.subr.bf16.mxu0 %v2671_v22  ;;  %2458 = vmatprep.subr.bf16.mxu1 %v2712_v2  ;;  %v279_v22 = vrot.slane %v274_v18, %v3231_v28  ;;  %v272_v33 = vrot.slane %v267_v21, %v3231_v28  ;;  %v2726_v2 = vld [vmem:[%s3875_s1 + $0x2ec] ss:$12 sps:$4 sm:$0xff]   ;;  %v2761_v21 = vld [vmem:[%s3875_s1 + $0x3a8] ss:$12 sps:$4 sm:$0xff]  }
  0xd1   :  { %v2749_v18 = vld [vmem:[%s3875_s1 + $0x360] ss:$12 sps:$4 sm:$0xff]  }
  0xd2   :  { %v292_v38 = vsub.bf16 %v148_v32, %v279_v22  ;;  %v362_v40 = vadd.bf16 %v279_v22, %v148_v32  ;;  %v2769_v22 = vld [vmem:[%s3875_s1 + $0x3dc] ss:$12 sps:$4 sm:$0xff]  }
  0xd3   :  { %1431 = vmatpush1.bf16.msra.mxu0 %v2669_v24  ;;  %2459 = vmatpush3.bf16.msra.mxu1 %v2713_v5  ;;  %v337_v24 = vpack.i.b16 %v236_v16, %v236_v16  ;;  %v2752_v5 = vld [vmem:[%s3875_s1 + $0x470] ss:$12 sps:$4 sm:$0xff]  }
  0xd4   :  { %1432 = vmatprep.subr.bf16.mxu0 %v2676_v34  ;;  %2466 = vmatprep.subr.bf16.mxu1 %v2717_v6  ;;  %v133_v34 = vld [vmem:[%s3874_s0 + $0x20] sm:$0xff]  ;;  %v369_v45 = vmul.bf16 1056980736, %v362_v40 }
  0xd5   :  { %v342_v39 = vrot.slane %v337_v24, %v3231_v28  ;;  %v147_v41 = vpack.c.bf16 %v140_v35, %v133_v34  ;;  %v2731_v6 = vld [vmem:[%s3875_s1 + $0x304] ss:$12 sps:$4 sm:$0xff]   ;;  %v2784_v35 = vld [vmem:[%s3875_s1 + $0x454] ss:$12 sps:$4 sm:$0xff]  }
  0xd6   :  { %1625 = vmatmul.mubr.bf16.vlgmr.msra.gmra.mrb[8].mxu1 %v3485_v63  ;;  %v2751_v16 = vld [vmem:[%s3875_s1 + $0x364] ss:$12 sps:$4 sm:$0xff]  }
  0xd7   :  { %1433 = vmatpush1.bf16.msra.mxu0 %v2674_v44  ;;  %2467 = vmatpush3.bf16.msra.mxu1 %v2718_v9  ;;  %v299_v44 = vand.u32 2147450879, %v292_v38  ;;  %v291_v46 = vsub.bf16 %v147_v41, %v272_v33  ;;  %v361_v47 = vadd.bf16 %v272_v33, %v147_v41  ;;  %v2736_v9 = vld [vmem:[%s3875_s1 + $0x31c] ss:$12 sps:$4 sm:$0xff]   ;;  %v2767_v24 = vld [vmem:[%s3875_s1 + $0x3d8] ss:$12 sps:$4 sm:$0xff]  }
  0xd8   :  { %1434 = vmatprep.subr.bf16.mxu0 %v2681_v51  ;;  %2468 = vmatprep.subr.bf16.mxu1 %v2722_v10  ;;  %v2734_v10 = vld [vmem:[%s3875_s1 + $0x318] ss:$12 sps:$4 sm:$0xff]   ;;  %v2781_v33 = vld [vmem:[%s3875_s1 + $0x43c] ss:$12 sps:$4 sm:$0xff]  }
  0xd9   :  { %vm355_vm6 = vcmp.lt.bf16.partialorder %v299_v44, %v342_v39  ;;  %v298_v50 = vand.u32 2147450879, %v291_v46  ;;  %v368_v51 = vmul.bf16 1056980736, %v361_v47  ;;  %v2779_v34 = vld [vmem:[%s3875_s1 + $0x438] ss:$12 sps:$4 sm:$0xff]  }
  0xda   :  { %v376_v53 = vsel %vm355_vm6, %v369_v45, %v148_v32  ;;  %v2776_v32 = vld [vmem:[%s3875_s1 + $0x420] ss:$12 sps:$4 sm:$0xff]   ;;  %v2785_v38 = vld [vmem:[%s3875_s1 + $0x468] ss:$12 sps:$4 sm:$0xff]   ;;  %v2794_v45 = vld [vmem:[%s3877_s3 + $0x58] sm:$0xff]  }
  0xdb   :  { %1435 = vmatpush1.bf16.msra.mxu0 %v2679_v60  ;;  %2469 = vmatpush3.bf16.msra.mxu1 %v2723_v55  ;;  %vm354_vm7 = vcmp.lt.bf16.partialorder %v298_v50, %v335_v43  ;;  %v2743_v60 = vld [vmem:[%s3875_s1 + $0x380] ss:$12 sps:$4 sm:$0xff]   ;;  %v2744_v55 = vld [vmem:[%s3875_s1 + $0x348] ss:$12 sps:$4 sm:$0xff]   ;;  %v2795_v46 = vld [vmem:[%s3877_s3 + $0x18] sm:$0xff]  }
  0xdc   :  { %1436 = vmatprep.subr.bf16.mxu0 %v2686_v62  ;;  %2470 = vmatprep.subr.bf16.mxu1 %v2727_v59  ;;  %v3596_v58 = vsel %vm354_vm7, %v368_v51, %v147_v41  ;;  %v2747_v62 = vld [vmem:[%s3875_s1 + $0x458] ss:$12 sps:$4 sm:$0xff]   ;;  %v2756_v59 = vld [vmem:[%s3875_s1 + $0x37c] ss:$12 sps:$4 sm:$0xff]   ;;  %v2792_v43 = vld [vmem:[%s3877_s3 + $0x50] sm:$0xff]  }
  0xdd   :  { %1665 = vmatprep.mubr.bf16.mxu1 %v376_v53  ;;  %v2788_v39 = vld [vmem:[%s3877_s3 + $0x40] sm:$0xff]   ;;  %v2790_v41 = vld [vmem:[%s3877_s3 + $0x48] sm:$0xff]   ;;  %v2793_v44 = vld [vmem:[%s3877_s3 + $0x10] sm:$0xff]  }
  0xde   :  { %v2789_v40 = vld [vmem:[%s3877_s3] sm:$0xff]  }
  0xdf   :  { %1437 = vmatpush1.bf16.msra.mxu0 %v2684_v11  ;;  %2471 = vmatpush3.bf16.msra.mxu1 %v2728_v56  ;;  %v2724_v11 = vld [vmem:[%s3875_s1 + $0x2e8] ss:$12 sps:$4 sm:$0xff]   ;;  %v2766_v56 = vld [vmem:[%s3875_s1 + $0x3c4] ss:$12 sps:$4 sm:$0xff]  }
  0xe0   :  { %1438 = vmatprep.subr.bf16.mxu0 %v2691_v4  ;;  %2472 = vmatprep.subr.bf16.mxu1 %v2732_v12  ;;  %v2748_v4 = vld [vmem:[%s3875_s1 + $0x398] ss:$12 sps:$4 sm:$0xff]   ;;  %v2764_v12 = vld [vmem:[%s3875_s1 + $0x3c0] ss:$12 sps:$4 sm:$0xff]  }
  0xe1   :  { %v2796_v51 = vld [vmem:[%s3877_s3 + $0x60] sm:$0xff]  }
  0xe3   :  { %1439 = vmatpush1.bf16.msra.mxu0 %v2689_v7  ;;  %2473 = vmatpush3.bf16.msra.mxu1 %v2733_v37  ;;  %v2753_v7 = vld [vmem:[%s3875_s1 + $0x3b0] ss:$12 sps:$4 sm:$0xff]   ;;  %v2787_v37 = vld [vmem:[%s3875_s1 + $0x46c] ss:$12 sps:$4 sm:$0xff]  }
  0xe4   :  { %1440 = vmatprep.subr.bf16.mxu0 %v2696_v8  ;;  %2474 = vmatprep.subr.bf16.mxu1 %v2737_v42  ;;  %v2729_v8 = vld [vmem:[%s3875_s1 + $0x300] ss:$12 sps:$4 sm:$0xff]  }
  0xe5   :  { %v2791_v42 = vld [vmem:[%s3877_s3 + $0x8] sm:$0xff]  }
  0xe7   :  { %1441 = vmatpush1.bf16.msra.mxu0 %v2694_v13  ;;  %2475 = vmatpush3.bf16.msra.mxu1 %v2738_v49  ;;  %v2741_v13 = vld [vmem:[%s3875_s1 + $0x334] ss:$12 sps:$4 sm:$0xff]  }
  0xe8   :  { %1442 = vmatprep.subr.bf16.mxu0 %v2701_v15  ;;  %2476 = vmatprep.subr.bf16.mxu1 %v2742_v52  ;;  %v2739_v15 = vld [vmem:[%s3875_s1 + $0x330] ss:$12 sps:$4 sm:$0xff]   ;;  %v2797_v52 = vld [vmem:[%s3877_s3 + $0x20] sm:$0xff]  }
  0xeb   :  { %1443 = vmatpush1.bf16.msra.mxu0 %v2699_v19  ;;  %2477 = vmatpush3.bf16.msra.mxu1 %v2743_v60  ;;  %v2757_v19 = vld [vmem:[%s3875_s1 + $0x390] ss:$12 sps:$4 sm:$0xff]   ;;  %v2798_v60 = vld [vmem:[%s3877_s3 + $0x68] sm:$0xff]  }
  0xec   :  { %1444 = vmatprep.subr.bf16.mxu0 %v2706_v20  ;;  %2478 = vmatprep.subr.bf16.mxu1 %v2747_v62  ;;  %v2763_v20 = vld [vmem:[%s3875_s1 + $0x3ac] ss:$12 sps:$4 sm:$0xff]  }
  0xef   :  { %1445 = vmatpush1.bf16.msra.mxu0 %v2704_v30  ;;  %2479 = vmatpush3.bf16.msra.mxu1 %v2748_v4  ;;  %v2773_v30 = vld [vmem:[%s3875_s1 + $0x408] ss:$12 sps:$4 sm:$0xff]  }
  0xf0   :  { %1446 = vmatprep.subr.bf16.mxu0 %v2711_v31  ;;  %2480 = vmatprep.subr.bf16.mxu1 %v2752_v5  ;;  %v2778_v31 = vld [vmem:[%s3875_s1 + $0x424] ss:$12 sps:$4 sm:$0xff]   ;;  %v2802_v5 = vld [vmem:[%s3877_s3 + $0x78] sm:$0xff]  }
  0xf1   :  { %v2801_v4 = vld [vmem:[%s3877_s3 + $0x30] sm:$0xff]  }
  0xf3   :  { %1447 = vmatpush1.bf16.msra.mxu0 %v2709_v36  ;;  %2481 = vmatpush3.bf16.msra.mxu1 %v2753_v7  ;;  %v2782_v36 = vld [vmem:[%s3875_s1 + $0x450] ss:$12 sps:$4 sm:$0xff]   ;;  %v574_v7 = vld [vmem:[%s3876_s2] sm:$0x7] }
  0xf4   :  { %1448 = vmatprep.subr.bf16.mxu0 %v2716_v48  ;;  %2526 = vmatprep.subr.bf16.mxu1 %v2996_v14 }
  0xf6   :  { %1666 = vmatmul.mubr.bf16.vlgmr.msra.gmra.mrb[12].mxu1 %v3596_v58 }
  0xf7   :  { %1449 = vmatpush1.bf16.msra.mxu0 %v2714_v54  ;;  %2527 = vmatpush3.bf16.msra.mxu1 %v2760_v23 }
  0xf8   :  { %1450 = vmatprep.subr.bf16.mxu0 %v2721_v57  ;;  %2528 = vmatprep.mubr.msk.bf16.mxu1 %vm2997_vm8, %v2996_v14 }
  0xf9   :  { %2490 = vmatprep.subr.bf16.mxu1 %v2788_v39 }
  0xfb   :  { %1451 = vmatpush1.bf16.msra.mxu0 %v2719_v1  ;;  %v2799_v1 = vld [vmem:[%s3877_s3 + $0x28] sm:$0xff]  }
  0xfc   :  { %1452 = vmatprep.subr.bf16.mxu0 %v2726_v2 }
  0xfe   :  { %2529 = vmatmul.mubr.msk.bf16.vlgmr.msra.gmra.mrb[16].mxu1 %vm1375_vm0, %v3281_v3  ;;  %v2759_v3 = vld [vmem:[%s3875_s1 + $0x394] ss:$12 sps:$4 sm:$0xff]  }
  0xff   :  { %1453 = vmatpush1.bf16.msra.mxu0 %v2724_v11  ;;  %2491 = vmatpush3.bf16.msra.mxu1 %v2789_v40  ;;  %v2800_v11 = vld [vmem:[%s3877_s3 + $0x70] sm:$0xff]  }
 0x100   :  { %1465 = vmatprep.subr.bf16.mxu0 %v2731_v6  ;;  %2492 = vmatprep.subr.bf16.mxu1 %v2790_v41  ;;  %v2803_v6 = vld [vmem:[%s3877_s3 + $0x38] sm:$0xff]  }
 0x102   :  { %1455 = vmatmul.mubr.bf16.vlgmr.msra.gmra.mrb[0].mxu0 %v3485_v63  ;;  %v2746_v63 = vld [vmem:[%s3875_s1 + $0x34c] ss:$12 sps:$4 sm:$0xff]  }
 0x103   :  { %1466 = vmatpush1.bf16.msra.mxu0 %v2729_v8  ;;  %1497 = vmatprep.mubr.bf16.mxu0 %v376_v53  ;;  %v587_v8 = vrot.slane %v574_v7, %v3386_v61 }
 0x104   :  { %1467 = vmatprep.subr.bf16.mxu0 %v2736_v9  ;;  %2493 = vmatpush3.bf16.msra.mxu1 %v2791_v42 }
 0x105   :  { %2494 = vmatprep.subr.bf16.mxu1 %v2792_v43 }
 0x107   :  { %1468 = vmatpush1.bf16.msra.mxu0 %v2734_v10 }
 0x108   :  { %1469 = vmatprep.subr.bf16.mxu0 %v2741_v13  ;;  %2495 = vmatpush3.bf16.msra.mxu1 %v2793_v44 }
 0x109   :  { %2496 = vmatprep.subr.bf16.mxu1 %v2794_v45 }
 0x10b   :  { %1470 = vmatpush1.bf16.msra.mxu0 %v2739_v15 }
 0x10c   :  { %1471 = vmatprep.subr.bf16.mxu0 %v2746_v63  ;;  %2497 = vmatpush3.bf16.msra.mxu1 %v2795_v46 }
 0x10d   :  { %2498 = vmatprep.subr.bf16.mxu1 %v2796_v51 }
 0x10f   :  { %1472 = vmatpush1.bf16.msra.mxu0 %v2744_v55 }
 0x110   :  { %1473 = vmatprep.subr.bf16.mxu0 %v2751_v16  ;;  %2499 = vmatpush3.bf16.msra.mxu1 %v2797_v52 }
 0x111   :  { %2500 = vmatprep.subr.bf16.mxu1 %v2798_v60 }
 0x113   :  { %1474 = vmatpush1.bf16.msra.mxu0 %v2749_v18 }
 0x114   :  { %1475 = vmatprep.subr.bf16.mxu0 %v2756_v59  ;;  %2501 = vmatpush3.bf16.msra.mxu1 %v2799_v1 }
 0x115   :  { %2502 = vmatprep.subr.bf16.mxu1 %v2800_v11 }
 0x117   :  { %1476 = vmatpush1.bf16.msra.mxu0 %v2754_v25 }
 0x118   :  { %1477 = vmatprep.subr.bf16.mxu0 %v2759_v3  ;;  %2503 = vmatpush3.bf16.msra.mxu1 %v2801_v4 }
 0x119   :  { %2504 = vmatprep.subr.bf16.mxu1 %v2802_v5 }
 0x11b   :  { %1478 = vmatpush1.bf16.msra.mxu0 %v2757_v19 }
 0x11c   :  { %1479 = vmatprep.subr.bf16.mxu0 %v2763_v20  ;;  %2505 = vmatpush3.bf16.msra.mxu1 %v2803_v6 }
 0x11d   :  { %2532 = vmatprep.subr.bf16.mxu1 %v2996_v14 }
 0x11f   :  { %1480 = vmatpush1.bf16.msra.mxu0 %v2761_v21 }
 0x120   :  { %1481 = vmatprep.subr.bf16.mxu0 %v2766_v56 }
 0x123   :  { %1482 = vmatpush1.bf16.msra.mxu0 %v2764_v12 }
 0x124   :  { %1483 = vmatprep.subr.bf16.mxu0 %v2769_v22 }
 0x127   :  { %1484 = vmatpush1.bf16.msra.mxu0 %v2767_v24 }
 0x128   :  { %1485 = vmatprep.subr.bf16.mxu0 %v2772_v26 }
 0x12b   :  { %1486 = vmatpush1.bf16.msra.mxu0 %v2770_v27 }
 0x12c   :  { %1487 = vmatprep.subr.bf16.mxu0 %v2775_v29 }
 0x12f   :  { %1488 = vmatpush1.bf16.msra.mxu0 %v2773_v30 }
 0x130   :  { %1489 = vmatprep.subr.bf16.mxu0 %v2778_v31 }
 0x133   :  { %1490 = vmatpush1.bf16.msra.mxu0 %v2776_v32 }
 0x134   :  { %1491 = vmatprep.subr.bf16.mxu0 %v2781_v33  ;;  %v1721_v33 = vld [vmem:[#allocation9] sm:$0x7] }
 0x137   :  { %1492 = vmatpush1.bf16.msra.mxu0 %v2779_v34  ;;  %v1726_v34 = vrot.slane %v1721_v33, %v3231_v28 }
 0x138   :  { %1493 = vmatprep.subr.bf16.mxu0 %v2784_v35  ;;  %v1730_v35 = vrot.slane %v1721_v33, %v3203_v17 }
 0x139   :  { %v1738_v39 = vpack.c.bf16 %v1726_v34, %v1726_v34 }
 0x13a   :  { %v1739_v42 = vpack.c.bf16 %v1730_v35, %v1730_v35 }
 0x13b   :  { %1494 = vmatpush1.bf16.msra.mxu0 %v2782_v36  ;;  %v579_v36 = vrot.slane %v574_v7, %v3231_v28 }
 0x13c   :  { %1495 = vmatprep.subr.bf16.mxu0 %v2787_v37  ;;  %v583_v37 = vrot.slane %v574_v7, %v3203_v17 }
 0x13f   :  { %1496 = vmatpush1.bf16.msra.mxu0 %v2785_v38  ;;  %v1741_v38 = vld [vmem:[#allocation7] sm:$0x7] }
 0x140   :  { %v1746_v40 = vrot.slane %v1741_v38, %v3231_v28  ;;  %v1750_v43 = vrot.slane %v1741_v38, %v3203_v17 }
 0x142   :  { %1498 = vmatmul.mubr.bf16.vlgmr.msra.gmra.mrb[0].mxu0 %v3596_v58  ;;  %v1759_v1 = vpack.c.bf16 %v1750_v43, %v1750_v43  ;;  %v2815_v43 = vld [vmem:[#allocation2 + $0x18] sm:$0xff]  }
 0x169   :  { %v3753_v47 = vpop.f32.mrb[0].mxu1 }
 0x16a   :  { %v3755_v48 = vpop.f32.mrb[1].mxu1 }
 0x16b   :  { %v3757_v49 = vpop.f32.mrb[2].mxu1 }
 0x16c   :  { %v3759_v50 = vpop.f32.mrb[3].mxu1 }
 0x189   :  { %v2438_v53 = vpop.f32.mrb[4].mxu1 }
 0x18a   :  { %v2439_v54 = vpop.f32.mrb[5].mxu1 }
 0x18b   :  { %v2440_v57 = vadd.f32 %v2439_v54, %v2438_v53  ;;  %v2441_v58 = vpop.f32.mrb[6].mxu1 }
 0x18c   :  { %v2442_v62 = vpop.f32.mrb[7].mxu1 }
 0x18d   :  { %v2443_v2 = vadd.f32 %v2442_v62, %v2441_v58  ;;  %v1586_v9 = vadd.f32 %v2440_v57, %v587_v8  ;;  %v1758_v57 = vpack.c.bf16 %v1746_v40, %v1746_v40  ;;  %v1762_v58 = vpack.i.b16 %v1738_v39, %v1738_v39  ;;  %v2812_v40 = vld [vmem:[#allocation2] sm:$0xff]  }
 0x18f   :  { %v1589_v13 = vadd.f32 %v2443_v2, %v587_v8  ;;  %v1769_v2 = vpack.i.b16 %v1739_v42, %v1739_v42  ;;  %v1767_v5 = vrot.slane %v1762_v58, %v3231_v28  ;;  %v1789_v6 = vpack.i.b16 %v1758_v57, %v1758_v57  ;;  %v2814_v42 = vld [vmem:[#allocation2 + $0x10] sm:$0xff]   ;;  %v2391_v57 = vld [vmem:[%s3878_s4] ss:$0 sm:$0xff] }
 0x190   :  { %v1796_v8 = vpack.i.b16 %v1759_v1, %v1759_v1 }
 0x1a9   :  { %v2460_v23 = vpop.f32.mrb[8].mxu1 }
 0x1aa   :  { %v2461_v10 = vpop.f32.mrb[9].mxu1 }
 0x1ab   :  { %v2462_v15 = vadd.f32 %v2461_v10, %v2460_v23  ;;  %v2463_v63 = vpop.f32.mrb[10].mxu1  ;;  %v1794_v10 = vrot.slane %v1789_v6, %v3231_v28 }
 0x1ac   :  { %v2464_v55 = vpop.f32.mrb[11].mxu1 }
 0x1ad   :  { %v1627_v16 = vadd.f32 %v2462_v15, %v1586_v9  ;;  %v2465_v18 = vadd.f32 %v2464_v55, %v2463_v63 }
 0x1af   :  { %v1630_v59 = vadd.f32 %v2465_v18, %v1589_v13 }
 0x1c9   :  { %v2482_v25 = vpop.f32.mrb[12].mxu1 }
 0x1ca   :  { %v2483_v3 = vpop.f32.mrb[13].mxu1 }
 0x1cb   :  { %v2484_v19 = vadd.f32 %v2483_v3, %v2482_v25  ;;  %v2485_v20 = vpop.f32.mrb[14].mxu1 }
 0x1cc   :  { %v2486_v21 = vpop.f32.mrb[15].mxu1 }
 0x1cd   :  { %v2487_v56 = vadd.f32 %v2486_v21, %v2485_v20  ;;  %v1668_v12 = vadd.f32 %v2484_v19, %v1627_v16  ;;  %v2805_v19 = vld [vmem:[%s3877_s3 + $0x88] sm:$0xff]   ;;  %v1734_v20 = vrot.slane %v1721_v33, %v3386_v61  ;;  %v2806_v21 = vld [vmem:[%s3877_s3 + $0x90] sm:$0xff]  }
 0x1cf   :  { %v1671_v22 = vadd.f32 %v2487_v56, %v1630_v59  ;;  %v2804_v59 = vld [vmem:[%s3877_s3 + $0x80] sm:$0xff]   ;;  %v1740_v56 = vpack.c.bf16 %v1734_v20, %v1734_v20 }
 0x1d1   :  { %v1708_v24 = vpop.f32.mrb[16].mxu1 }
 0x1d2   :  { %v3790_v26 = vadd.f32 %v1708_v24, %v1668_v12  ;;  %v2530_v27 = vpop.f32.mrb[17].mxu1  ;;  %v2807_v12 = vld [vmem:[%s3877_s3 + $0x98] sm:$0xff]   ;;  %v1776_v24 = vpack.i.b16 %v1740_v56, %v1740_v56 }
 0x1d3   :  { %v1711_v29 = vpop.f32.mrb[18].mxu1  ;;  %v2808_v27 = vld [vmem:[%s3877_s3 + $0xa0] sm:$0xff]  }
 0x1d4   :  { %v3792_v30 = vadd.f32 %v1711_v29, %v1671_v22  ;;  %v2531_v31 = vpop.f32.mrb[19].mxu1  ;;  %v1754_v22 = vrot.slane %v1741_v38, %v3386_v61  ;;  %v1781_v33 = vrot.slane %v1776_v24, %v3231_v28  ;;  %v2809_v61 = vld [vmem:[%s3877_s3 + $0xa8] sm:$0xff]  }
 0x1d6   :  { %v1717_v32 = vpack.c.bf16 %v3792_v30, %v3790_v26  ;;  %v1760_v31 = vpack.c.bf16 %v1754_v22, %v1754_v22 }
 0x1d8   :  { %v1720_v29 = vmax.bf16 %v2995_v0, %v1717_v32  ;;  %v1803_v35 = vpack.i.b16 %v1760_v31, %v1760_v31 }
 0x1da   :  { %v1784_v34 = vsub.bf16 %v1720_v29, %v1781_v33  ;;  %v1814_v26 = vadd.bf16 %v1781_v33, %v1720_v29  ;;  %v1808_v32 = vrot.slane %v1803_v35, %v3231_v28 }
 0x1dc   :  { %v1787_v30 = vand.u32 2147450879, %v1784_v34  ;;  %v1817_v38 = vmul.bf16 1056980736, %v1814_v26 }
 0x1de   :  { %vm1811_vm11 = vcmp.lt.bf16.partialorder %v1787_v30, %v1808_v32 }
 0x1df   :  { %v1820_v39 = vsel %vm1811_vm11, %v1817_v38, %v1720_v29 }
 0x215   :  { %v1499_v41 = vpop.f32.mrb[0].mxu0 }
 0x216   :  { %v2564_v44 = vadd.f32 %v1499_v41, %v579_v36  ;;  %v1501_v45 = vpop.f32.mrb[1].mxu0  ;;  %v2813_v41 = vld [vmem:[#allocation2 + $0x8] sm:$0xff]  }
 0x217   :  { %v2566_v46 = vadd.f32 %v1501_v45, %v583_v37  ;;  %v1503_v51 = vpop.f32.mrb[2].mxu0 }
 0x218   :  { %v2565_v52 = vadd.f32 %v2564_v44, %v3753_v47  ;;  %v2568_v53 = vadd.f32 %v1503_v51, %v579_v36  ;;  %v1505_v54 = vpop.f32.mrb[3].mxu0  ;;  %v1774_v47 = vrot.slane %v1769_v2, %v3231_v28  ;;  %v2810_v36 = vld [vmem:[%s3877_s3 + $0xb0] sm:$0xff]  }
 0x219   :  { %v2567_v60 = vadd.f32 %v2566_v46, %v3755_v48  ;;  %v2570_v62 = vadd.f32 %v1505_v54, %v583_v37  ;;  %v2811_v37 = vld [vmem:[%s3877_s3 + $0xb8] sm:$0xff]  }
 0x21a   :  { %v2569_v11 = vadd.f32 %v2568_v53, %v3757_v49  ;;  %v1801_v49 = vrot.slane %v1796_v8, %v3231_v28  ;;  %v2104_v54 = vld [vmem:[#allocation12] sm:$0x1] }
 0x21b   :  { %v2571_v4 = vadd.f32 %v2570_v62, %v3759_v50  ;;  %v2105_v58 = vpack.c.bf16 %v2104_v54, %v2104_v54 }
 0x21c   :  { %v1715_v17 = vpack.c.bf16 %v2569_v11, %v2565_v52 }
 0x21d   :  { %v1716_v7 = vpack.c.bf16 %v2571_v4, %v2567_v60  ;;  %v2106_v60 = vld [vmem:[#allocation10] sm:$0x1]  ;;  %v2109_v4 = vpack.i.b16 %v2105_v58, %v2105_v58 }
 0x21e   :  { %v1718_v9 = vmax.bf16 %v2995_v0, %v1715_v17  ;;  %v2107_v17 = vpack.c.bf16 %v2106_v60, %v2106_v60 }
 0x21f   :  { %v1719_v23 = vmax.bf16 %v2995_v0, %v1716_v7  ;;  %v2114_v8 = vrot.slane %v2109_v4, %v3231_v28 }
 0x220   :  { %v1782_v48 = vsub.bf16 %v1718_v9, %v1767_v5  ;;  %v1812_v13 = vadd.bf16 %v1767_v5, %v1718_v9 }
 0x221   :  { %v1783_v15 = vsub.bf16 %v1719_v23, %v1774_v47  ;;  %v1813_v50 = vadd.bf16 %v1774_v47, %v1719_v23 }
 0x222   :  { %v1785_v63 = vand.u32 2147450879, %v1782_v48  ;;  %v1815_v18 = vmul.bf16 1056980736, %v1812_v13 }
 0x223   :  { %v1786_v55 = vand.u32 2147450879, %v1783_v15  ;;  %v1816_v16 = vmul.bf16 1056980736, %v1813_v50 }
 0x224   :  { %vm1809_vm9 = vcmp.lt.bf16.partialorder %v1785_v63, %v1794_v10  ;;  %v2416_v63 = vld [vmem:[%s3880_s6] ss:$0 sm:$0xff] }
 0x225   :  { %vm1810_vm10 = vcmp.lt.bf16.partialorder %v1786_v55, %v1801_v49  ;;  %v1818_v3 = vsel %vm1809_vm9, %v1815_v18, %v1718_v9  ;;  %v2118_v9 = vpack.i.b16 %v2107_v17, %v2107_v17 }
 0x226   :  { %v1819_v25 = vsel %vm1810_vm10, %v1816_v16, %v1719_v23 }
 0x227   :  { %2052 = vmatprep.mubr.bf16.mxu1 %v1819_v25  ;;  %v2123_v13 = vrot.slane %v2118_v9, %v3231_v28 }
 0x228   :  { %2053 = vmatmul.mubr.bf16.vlgmr.msra.gmra.mrb[20].mxu1 %v1818_v3 }
 0x229   :  { %2533 = vmatpush3.bf16.msra.mxu1 %v2804_v59  ;;  %2548 = vmatprep.mubr.msk.bf16.mxu1 %vm2997_vm8, %v2996_v14 }
 0x22a   :  { %2534 = vmatprep.subr.bf16.mxu1 %v2996_v14 }
 0x22d   :  { %2535 = vmatpush3.bf16.msra.mxu1 %v2805_v19 }
 0x22e   :  { %2536 = vmatprep.subr.bf16.mxu1 %v2996_v14 }
 0x231   :  { %2537 = vmatpush3.bf16.msra.mxu1 %v2806_v21 }
 0x232   :  { %2538 = vmatprep.subr.bf16.mxu1 %v2996_v14 }
 0x235   :  { %2539 = vmatpush3.bf16.msra.mxu1 %v2807_v12 }
 0x236   :  { %2540 = vmatprep.subr.bf16.mxu1 %v2996_v14 }
 0x239   :  { %2541 = vmatpush3.bf16.msra.mxu1 %v2808_v27 }
 0x23a   :  { %2542 = vmatprep.subr.bf16.mxu1 %v2996_v14 }
 0x23d   :  { %2543 = vmatpush3.bf16.msra.mxu1 %v2809_v61 }
 0x23e   :  { %2544 = vmatprep.subr.bf16.mxu1 %v2996_v14 }
 0x241   :  { %2545 = vmatpush3.bf16.msra.mxu1 %v2810_v36 }
 0x242   :  { %2546 = vmatprep.subr.bf16.mxu1 %v2996_v14 }
 0x245   :  { %2547 = vmatpush3.bf16.msra.mxu1 %v2811_v37 }
 0x246   :  { %2552 = vmatprep.subr.bf16.mxu1 %v2996_v14 }
 0x248   :  { %2549 = vmatmul.mubr.bf16.vlgmr.msra.gmra.mrb[24].mxu1 %v1820_v39 }
 0x249   :  { %2560 = vmatprep.mubr.msk.bf16.mxu1 %vm2997_vm8, %v2996_v14  ;;  %2553 = vmatpush3.bf16.msra.mxu1 %v2812_v40 }
 0x24a   :  { %2554 = vmatprep.subr.bf16.mxu1 %v2996_v14 }
 0x24d   :  { %2555 = vmatpush3.bf16.msra.mxu1 %v2813_v41 }
 0x24e   :  { %2556 = vmatprep.subr.bf16.mxu1 %v2996_v14 }
 0x251   :  { %2557 = vmatpush3.bf16.msra.mxu1 %v2814_v42 }
 0x252   :  { %2558 = vmatprep.subr.bf16.mxu1 %v2996_v14 }
 0x255   :  { %2559 = vmatpush3.bf16.msra.mxu1 %v2815_v43 }
 0x2fb   :  { %v2506_v44 = vpop.f32.mrb[20].mxu1 }
 0x2fc   :  { %v2507_v45 = vpop.f32.mrb[21].mxu1 }
 0x2fd   :  { %v2508_v46 = vadd.f32 %v2507_v45, %v2506_v44  ;;  %v2509_v51 = vpop.f32.mrb[22].mxu1 }
 0x2fe   :  { %v2510_v52 = vpop.f32.mrb[23].mxu1 }
 0x2ff   :  { %v2511_v53 = vadd.f32 %v2510_v52, %v2509_v51  ;;  %v2055_v62 = vadd.f32 %v2508_v46, %v2391_v57 }
 0x301   :  { %v2058_v14 = vadd.f32 %v2511_v53, %v2391_v57 }
 0x31b   :  { %v2095_v1 = vpop.f32.mrb[24].mxu1 }
 0x31c   :  { %v2096_v2 = vadd.f32 %v2095_v1, %v2055_v62  ;;  %v2550_v11 = vpop.f32.mrb[25].mxu1 }
 0x31d   :  { %v2098_v5 = vpop.f32.mrb[26].mxu1 }
 0x31e   :  { %v2099_v6 = vadd.f32 %v2098_v5, %v2058_v14  ;;  %v2551_v7 = vpop.f32.mrb[27].mxu1 }
 0x320   :  { %v2102_v47 = vpack.c.bf16 %v2099_v6, %v2096_v2 }
 0x322   :  { %v2103_v23 = vmax.bf16 %v2995_v0, %v2102_v47 }
 0x324   :  { %v2115_v48 = vsub.bf16 %v2103_v23, %v2114_v8  ;;  %v2125_v10 = vadd.bf16 %v2114_v8, %v2103_v23 }
 0x326   :  { %v2116_v15 = vand.u32 2147450879, %v2115_v48  ;;  %v2126_v49 = vmul.bf16 1056980736, %v2125_v10 }
 0x328   :  { %vm2124_vm13 = vcmp.lt.bf16.partialorder %v2116_v15, %v2123_v13 }
 0x329   :  { %v2127_v50 = vsel %vm2124_vm13, %v2126_v49, %v2103_v23 }
 0x32a   :  { %2561 = vmatmul.mubr.msk.bf16.vlgmr.msra.gmra.mrb[28].mxu1 %vm2167_vm12, %v2127_v50 }
 0x3fd   :  { %v2205_v55 = vpop.f32.mrb[28].mxu1 }
 0x3fe   :  { %v2206_v16 = vadd.f32 %v2416_v63, %v2205_v55  ;;  %v2562_v18 = vpop.f32.mrb[29].mxu1 }
 0x3ff   :  { %v2208_v59 = vpop.f32.mrb[30].mxu1 }
 0x400   :  { %2212 = vmax.xlane.f32.xlu0 %v2206_v16  ;;  %v2563_v0 = vpop.f32.mrb[31].mxu1  ;;  %v2209_v25 = vadd.f32 %v2416_v63, %v2208_v59 }
 0x404   :  { %2214 = vmax.xlane.f32.xlu0 %v2209_v25 }
 0x48d   :  { %v2213_v3 = vpop.xlane.xlu0 %2212 }
 0x48e   :  { %v2216_v28 = vsub.f32 %v2206_v16, %v2213_v3 }
 0x490   :  { %v2218_v19 = vmul.f32 1.442695, %v2216_v28 }
 0x491   :  { %v2215_v20 = vpop.xlane.xlu0 %2214 }
 0x492   :  { %v2217_v21 = vsub.f32 %v2209_v25, %v2215_v20  ;;  %2816 = vpow2.f32 %v2218_v19 }
 0x494   :  { %v2220_v56 = vmul.f32 1.442695, %v2217_v21 }
 0x496   :  { %2818 = vpow2.f32 %v2220_v56 }
 0x49c   :  { %v2817_v12 = vpop.eup %2816 }
 0x49d   :  { %2222 = vadd.xlane.f32.xlu1 %v2817_v12 }
 0x4a0   :  { %v2819_v22 = vpop.eup %2818 }
 0x4a1   :  { %2224 = vadd.xlane.f32.xlu1 %v2819_v22 }
 0x52a   :  { %v2223_v24 = vpop.xlane.xlu1 %2222 }
 0x52b   :  { %2820 = vlog2.f32 %v2223_v24 }
 0x52e   :  { %v2225_v27 = vpop.xlane.xlu1 %2224 }
 0x52f   :  { %2822 = vlog2.f32 %v2225_v27 }
 0x535   :  { %v2821_v29 = vpop.eup %2820 }
 0x536   :  { %v2227_v31 = vmul.f32 0.6931472, %v2821_v29 }
 0x538   :  { %v2230_v33 = vsub.f32 %v2216_v28, %v2227_v31 }
 0x539   :  { %v2823_v61 = vpop.eup %2822 }
 0x53a   :  { %2232 = vst [vmem:[%s3887_s13] sm:$0xff] %v2230_v33  ;;  %v2229_v34 = vmul.f32 0.6931472, %v2823_v61 }
 0x53c   :  { %v2231_v35 = vsub.f32 %v2217_v21, %v2229_v34 }
 0x53e   :  { %2233 = vst [vmem:[%s3887_s13 + $0x8] sm:$0xff] %v2231_v35 }
 0x53f   :  { %2238 = vsyncpa [#allocation3], 1 }
 0x540   :  { %2239 = vsyncpa [#allocation5], 1 }
 0x541   :  { %2240 = vsyncpa [#allocation8], 1 }
 0x542   :  { %2241 = vsyncpa [#allocation11], 1 }

</bundles_post_ra>
